<compile_context>
chip_gen: v6e
topology: v6e:2x2x1
jax: 0.10.0
libtpu: 0.0.40
codegen_flags: <defaults>
</compile_context>

<pallas_src>
import functools

import jax
import jax.numpy as jnp
from jax import lax
from jax.experimental import pallas as pl
from jax.experimental.pallas import tpu as pltpu


def _continuous_sum_kernel(x_ref, t_ref, s_ref, b_ref, o_ref, *,
                           alpha, beta, j0, clip_val, j_chunk):
    # All refs: (TR, Lp) lane-dense f32 blocks of the row-flattened inputs.
    tr, lp = o_ref.shape
    n_chunks = lp // j_chunk

    # ---- per-j window factors (once per grid step, O(Lp) exps) -------------
    #   u_j = exp(alpha * (j0 - j)),  v_j = exp(beta * (j - j0))
    #   U[j, :] = [1, u_j, v_j, u_j v_j, 0, 0, 0, 0]   (K padded 4 -> 8)
    jpos = lax.broadcasted_iota(jnp.int32, (lp, 1), 0).astype(jnp.float32)
    u = jnp.exp(jnp.clip(alpha * (j0 - jpos), -clip_val, clip_val))
    v = jnp.exp(jnp.clip(beta * (jpos - j0), -clip_val, clip_val))
    kcol = lax.broadcasted_iota(jnp.int32, (lp, 8), 1)
    u_mat = jnp.where(kcol == 0, 1.0,
            jnp.where(kcol == 1, u,
            jnp.where(kcol == 2, v,
            jnp.where(kcol == 3, u * v, 0.0))))                # (Lp, 8)

    # ---- per-(row, i) edge factors (once per grid step, O(TR*Lp) exps) -----
    #   p = exp(alpha * (t - j0)),  q = exp(beta * (j0 - s))
    p = jnp.exp(jnp.clip(alpha * (t_ref[...] - j0), -clip_val, clip_val))
    q = jnp.exp(jnp.clip(beta * (j0 - s_ref[...]), -clip_val, clip_val))
    pq = p * q

    # x values along sublanes so the per-row j-weighting is a lane broadcast.
    x_t = jnp.transpose(x_ref[...], (1, 0))                    # (Lp, TR)

    krow = lax.broadcasted_iota(jnp.int32, (8, lp), 0)          # P-row selector

    # Static unroll over the rows of this block; per-row live set is the
    # (j_chunk, Lp) D / w / wx slabs (~16 vregs each at the defaults).
    # TODO(synk): if a bundle dump ever shows spills at large row_tile, bound
    # live ranges with lax.fori_loop over rows instead of the static unroll.
    for r in range(tr):
        # P_r[:, i] = [1, p_ri, q_ri, p_ri q_ri, 0, 0, 0, 0]
        p_mat = jnp.where(krow == 0, 1.0,
                jnp.where(krow == 1, p[r:r + 1, :],
                jnp.where(krow == 2, q[r:r + 1, :],
                jnp.where(krow == 3, pq[r:r + 1, :], 0.0))))    # (8, Lp)
        xcol = x_t[:, r:r + 1]                                   # (Lp, 1)

        acc = jnp.zeros((1, lp), jnp.float32)
        for c in range(n_chunks):
            lo = c * j_chunk
            # Denominator on the MXU (DEFAULT precision, single pass).
            d = jnp.dot(u_mat[lo:lo + j_chunk, :], p_mat,
                        preferred_element_type=jnp.float32)     # (j_chunk, Lp)
            w = pl.reciprocal(d, approx=True)                   # EUP, 1 op/elem
            # x-weighting + j-sum: exact f32 on the VPU (+ sublane tree).
            acc = acc + jnp.sum(w * xcol[lo:lo + j_chunk, :],
                                axis=0, keepdims=True)
        o_ref[r:r + 1, :] = (acc + b_ref[r:r + 1, :]).astype(o_ref.dtype)


def continuous_pool1d(x, t, s, b, alpha: float, beta: float, *,
                      row_tile: int = 32, j_chunk: int = 128):
    """Pallas ContinousPool1D.forward.  x: (N, C, L); t/s/b: same shape or float.

    row_tile: rows (N*C flattened) per grid step (sublane-rounded).  32 hides
      the ~0.35us per-step pipeline overhead; for v7x pick it so the grid has
      >= 2 steps so both TensorCores are used.
    j_chunk:  j-tile of the streamed reduction; 128 keeps the per-row D/w
      slabs <= 64 KiB for any L (only matters for very large L).
    """
    x = jnp.asarray(x, jnp.float32)
    shape = x.shape
    # Match the torch module: float t/s/b broadcast to x.shape.
    # TODO(synk): SMEM/scalar-prefetch fast path for scalar t/s/b would drop
    # three full-size HBM operands; the kernel is compute-bound so low priority.
    t = jnp.broadcast_to(jnp.asarray(t, jnp.float32), shape)
    s = jnp.broadcast_to(jnp.asarray(s, jnp.float32), shape)
    b = jnp.broadcast_to(jnp.asarray(b, jnp.float32), shape)

    N, C, L = shape
    R = N * C

    def _rup(a, m):
        return ((a + m - 1) // m) * m

    tr = min(_rup(row_tile, 8), _rup(R, 8))   # sublane-aligned row tile
    rp = _rup(R, tr)
    lp = _rup(L, 128)                         # lane-dense blocks, unmasked vst
    jc = min(j_chunk, lp)
    assert lp % jc == 0, (lp, jc)

    def _prep(a):
        a = a.reshape(R, L)
        return jnp.pad(a, ((0, rp - R), (0, lp - L)))

    xf, tf, sf, bf = _prep(x), _prep(t), _prep(s), _prep(b)

    kernel = functools.partial(
        _continuous_sum_kernel,
        alpha=float(alpha), beta=float(beta),
        j0=0.5 * (L - 1),      # exponent split around the true-window midpoint
        clip_val=44.0,         # e^44 * e^44 stays finite in f32; no extra caps
        j_chunk=jc)

    def _row_spec():
        return pl.BlockSpec((tr, lp), lambda i: (i, 0))

    out = pl.pallas_call(
        kernel,
        out_shape=jax.ShapeDtypeStruct((rp, lp), jnp.float32),
        grid_spec=pltpu.PrefetchScalarGridSpec(
            num_scalar_prefetch=0,
            grid=(rp // tr,),
            in_specs=[_row_spec(), _row_spec(), _row_spec(), _row_spec()],
            out_specs=_row_spec()),
        compiler_params=pltpu.CompilerParams(
            dimension_semantics=("parallel",)),
    )(xf, tf, sf, bf)

    return out[:R, :L].reshape(N, C, L)


def _reference(x, t, s, b, alpha, beta):
    # pure-JAX reference of the same semantics
    jpos = jnp.arange(x.shape[-1], dtype=jnp.float32)[None, None, :, None]  # (1,1,j,1)
    ti = t[:, :, None, :]                                                   # (N,C,1,i)
    si = s[:, :, None, :]
    w = jax.nn.sigmoid(alpha * (jpos - ti)) * jax.nn.sigmoid(beta * (si - jpos))
    return jnp.sum(w * x[:, :, :, None], axis=2) + b


if __name__ == "__main__":
    key = jax.random.PRNGKey(0)
    k1, k2, k3, k4 = jax.random.split(key, 4)

    N, C, L = 2, 4, 128
    alpha, beta = 0.5, 0.5

    x = jax.random.normal(k1, (N, C, L), jnp.float32)
    t = jax.random.uniform(k2, (N, C, L), jnp.float32, 0.0, L / 2)        # rising edge
    s = jax.random.uniform(k3, (N, C, L), jnp.float32, L / 2, float(L))   # falling edge
    b = 0.1 * jax.random.normal(k4, (N, C, L), jnp.float32)

    out = continuous_pool1d(x, t, s, b, alpha, beta)
    out = jax.block_until_ready(out)

    ref = _reference(x, t, s, b, alpha, beta)
    assert out.shape == (N, C, L)
    assert bool(jnp.all(jnp.isfinite(out)))

    # Error budget: the denominator matmul runs at DEFAULT (single-pass bf16)
    # MXU precision and the reciprocal is the EUP approximation, so each of
    # the ~L window weights carries ~0.3-0.5% relative error; the x-weighted
    # j-sum itself is exact f32.  Over an ~L-term reduction of |x|~1 values
    # that is up to ~1e-1 absolute on outputs of magnitude ~sqrt(L), i.e.
    # well under 1-2% in aggregate.
    err = jnp.abs(out - ref)
    assert bool(jnp.all(err <= 0.2 + 2e-2 * jnp.abs(ref))), float(jnp.max(err))
    assert float(jnp.mean(err)) < 0.1, float(jnp.mean(err))
    rel_fro = float(jnp.linalg.norm(out - ref) / jnp.linalg.norm(ref))
    assert rel_fro < 2e-2, rel_fro

    print("KERNEL_OK")
</pallas_src>

<mosaic_0001>
module attributes {stable_mosaic.version = 11 : i64} {
  func.func @_continuous_sum_kernel(%arg0: i32, %arg1: memref<8x128xf32, #tpu.memory_space<vmem>>, %arg2: memref<8x128xf32, #tpu.memory_space<vmem>>, %arg3: memref<8x128xf32, #tpu.memory_space<vmem>>, %arg4: memref<8x128xf32, #tpu.memory_space<vmem>>, %arg5: memref<8x128xf32, #tpu.memory_space<vmem>>) attributes {dimension_semantics = [#tpu.dimension_semantics<parallel>], iteration_bounds = array<i64: 1>, scalar_prefetch = 0 : i64, scratch_operands = 0 : i64, tpu.core_type = #tpu.core_type<tc>, window_params = [{transform_indices = @transform_0, window_bounds = array<i64: 8, 128>}, {transform_indices = @transform_1, window_bounds = array<i64: 8, 128>}, {transform_indices = @transform_2, window_bounds = array<i64: 8, 128>}, {transform_indices = @transform_3, window_bounds = array<i64: 8, 128>}, {transform_indices = @transform_4, window_bounds = array<i64: 8, 128>}]} {
    %0 = tpu.iota {dimensions = array<i32: 0>} : vector<128x1xi32>
    %1 = arith.sitofp %0 : vector<128x1xi32> to vector<128x1xf32>
    %cst = arith.constant 6.350000e+01 : f32
    %2 = vector.broadcast %cst : f32 to vector<128x1xf32>
    %3 = arith.subf %2, %1 : vector<128x1xf32>
    %cst_0 = arith.constant 5.000000e-01 : f32
    %4 = vector.broadcast %cst_0 : f32 to vector<128x1xf32>
    %5 = arith.mulf %4, %3 : vector<128x1xf32>
    %cst_1 = arith.constant -4.400000e+01 : f32
    %cst_2 = arith.constant 4.400000e+01 : f32
    %6 = vector.broadcast %cst_1 : f32 to vector<128x1xf32>
    %7 = arith.maximumf %6, %5 : vector<128x1xf32>
    %8 = vector.broadcast %cst_2 : f32 to vector<128x1xf32>
    %9 = arith.minimumf %8, %7 : vector<128x1xf32>
    %10 = math.exp %9 : vector<128x1xf32>
    %cst_3 = arith.constant 6.350000e+01 : f32
    %11 = vector.broadcast %cst_3 : f32 to vector<128x1xf32>
    %12 = arith.subf %1, %11 : vector<128x1xf32>
    %cst_4 = arith.constant 5.000000e-01 : f32
    %13 = vector.broadcast %cst_4 : f32 to vector<128x1xf32>
    %14 = arith.mulf %13, %12 : vector<128x1xf32>
    %cst_5 = arith.constant -4.400000e+01 : f32
    %cst_6 = arith.constant 4.400000e+01 : f32
    %15 = vector.broadcast %cst_5 : f32 to vector<128x1xf32>
    %16 = arith.maximumf %15, %14 : vector<128x1xf32>
    %17 = vector.broadcast %cst_6 : f32 to vector<128x1xf32>
    %18 = arith.minimumf %17, %16 : vector<128x1xf32>
    %19 = math.exp %18 : vector<128x1xf32>
    %20 = tpu.iota {dimensions = array<i32: 1>} : vector<128x8xi32>
    %c0_i32 = arith.constant 0 : i32
    %21 = vector.broadcast %c0_i32 : i32 to vector<128x8xi32>
    %22 = arith.cmpi eq, %20, %21 : vector<128x8xi32>
    %c1_i32 = arith.constant 1 : i32
    %23 = vector.broadcast %c1_i32 : i32 to vector<128x8xi32>
    %24 = arith.cmpi eq, %20, %23 : vector<128x8xi32>
    %c2_i32 = arith.constant 2 : i32
    %25 = vector.broadcast %c2_i32 : i32 to vector<128x8xi32>
    %26 = arith.cmpi eq, %20, %25 : vector<128x8xi32>
    %c3_i32 = arith.constant 3 : i32
    %27 = vector.broadcast %c3_i32 : i32 to vector<128x8xi32>
    %28 = arith.cmpi eq, %20, %27 : vector<128x8xi32>
    %29 = arith.mulf %10, %19 : vector<128x1xf32>
    %cst_7 = arith.constant 0.000000e+00 : f32
    %30 = vector.shape_cast %29 : vector<128x1xf32> to vector<128x1xf32>
    %31 = vector.broadcast %30 : vector<128x1xf32> to vector<128x8xf32>
    %32 = vector.broadcast %cst_7 : f32 to vector<128x8xf32>
    %33 = arith.select %28, %31, %32 : vector<128x8xi1>, vector<128x8xf32>
    %34 = vector.shape_cast %19 : vector<128x1xf32> to vector<128x1xf32>
    %35 = vector.broadcast %34 : vector<128x1xf32> to vector<128x8xf32>
    %36 = arith.select %26, %35, %33 : vector<128x8xi1>, vector<128x8xf32>
    %37 = vector.shape_cast %10 : vector<128x1xf32> to vector<128x1xf32>
    %38 = vector.broadcast %37 : vector<128x1xf32> to vector<128x8xf32>
    %39 = arith.select %24, %38, %36 : vector<128x8xi1>, vector<128x8xf32>
    %cst_8 = arith.constant 1.000000e+00 : f32
    %40 = vector.broadcast %cst_8 : f32 to vector<128x8xf32>
    %41 = arith.select %22, %40, %39 : vector<128x8xi1>, vector<128x8xf32>
    %c0 = arith.constant 0 : index
    %c0_9 = arith.constant 0 : index
    %42 = vector.load %arg2[%c0, %c0_9] : memref<8x128xf32, #tpu.memory_space<vmem>>, vector<8x128xf32>
    %cst_10 = arith.constant 6.350000e+01 : f32
    %43 = vector.broadcast %cst_10 : f32 to vector<8x128xf32>
    %44 = arith.subf %42, %43 : vector<8x128xf32>
    %cst_11 = arith.constant 5.000000e-01 : f32
    %45 = vector.broadcast %cst_11 : f32 to vector<8x128xf32>
    %46 = arith.mulf %45, %44 : vector<8x128xf32>
    %cst_12 = arith.constant -4.400000e+01 : f32
    %cst_13 = arith.constant 4.400000e+01 : f32
    %47 = vector.broadcast %cst_12 : f32 to vector<8x128xf32>
    %48 = arith.maximumf %47, %46 : vector<8x128xf32>
    %49 = vector.broadcast %cst_13 : f32 to vector<8x128xf32>
    %50 = arith.minimumf %49, %48 : vector<8x128xf32>
    %51 = math.exp %50 : vector<8x128xf32>
    %c0_14 = arith.constant 0 : index
    %c0_15 = arith.constant 0 : index
    %52 = vector.load %arg3[%c0_14, %c0_15] : memref<8x128xf32, #tpu.memory_space<vmem>>, vector<8x128xf32>
    %cst_16 = arith.constant 6.350000e+01 : f32
    %53 = vector.broadcast %cst_16 : f32 to vector<8x128xf32>
    %54 = arith.subf %53, %52 : vector<8x128xf32>
    %cst_17 = arith.constant 5.000000e-01 : f32
    %55 = vector.broadcast %cst_17 : f32 to vector<8x128xf32>
    %56 = arith.mulf %55, %54 : vector<8x128xf32>
    %cst_18 = arith.constant -4.400000e+01 : f32
    %cst_19 = arith.constant 4.400000e+01 : f32
    %57 = vector.broadcast %cst_18 : f32 to vector<8x128xf32>
    %58 = arith.maximumf %57, %56 : vector<8x128xf32>
    %59 = vector.broadcast %cst_19 : f32 to vector<8x128xf32>
    %60 = arith.minimumf %59, %58 : vector<8x128xf32>
    %61 = math.exp %60 : vector<8x128xf32>
    %62 = arith.mulf %51, %61 : vector<8x128xf32>
    %c0_20 = arith.constant 0 : index
    %c0_21 = arith.constant 0 : index
    %63 = vector.load %arg1[%c0_20, %c0_21] : memref<8x128xf32, #tpu.memory_space<vmem>>, vector<8x128xf32>
    %64 = tpu.transpose %63, [1, 0] : vector<8x128xf32> -> vector<128x8xf32>
    %65 = tpu.iota {dimensions = array<i32: 0>} : vector<8x128xi32>
    %c0_i32_22 = arith.constant 0 : i32
    %66 = vector.broadcast %c0_i32_22 : i32 to vector<8x128xi32>
    %67 = arith.cmpi eq, %65, %66 : vector<8x128xi32>
    %c1_i32_23 = arith.constant 1 : i32
    %68 = vector.broadcast %c1_i32_23 : i32 to vector<8x128xi32>
    %69 = arith.cmpi eq, %65, %68 : vector<8x128xi32>
    %70 = vector.extract_strided_slice %51 {offsets = [0, 0], sizes = [1, 128], strides = [1, 1]} : vector<8x128xf32> to vector<1x128xf32>
    %c2_i32_24 = arith.constant 2 : i32
    %71 = vector.broadcast %c2_i32_24 : i32 to vector<8x128xi32>
    %72 = arith.cmpi eq, %65, %71 : vector<8x128xi32>
    %73 = vector.extract_strided_slice %61 {offsets = [0, 0], sizes = [1, 128], strides = [1, 1]} : vector<8x128xf32> to vector<1x128xf32>
    %c3_i32_25 = arith.constant 3 : i32
    %74 = vector.broadcast %c3_i32_25 : i32 to vector<8x128xi32>
    %75 = arith.cmpi eq, %65, %74 : vector<8x128xi32>
    %76 = vector.extract_strided_slice %62 {offsets = [0, 0], sizes = [1, 128], strides = [1, 1]} : vector<8x128xf32> to vector<1x128xf32>
    %cst_26 = arith.constant 0.000000e+00 : f32
    %77 = vector.shape_cast %76 : vector<1x128xf32> to vector<1x128xf32>
    %78 = vector.broadcast %77 : vector<1x128xf32> to vector<8x128xf32>
    %79 = vector.broadcast %cst_26 : f32 to vector<8x128xf32>
    %80 = arith.select %75, %78, %79 : vector<8x128xi1>, vector<8x128xf32>
    %81 = vector.shape_cast %73 : vector<1x128xf32> to vector<1x128xf32>
    %82 = vector.broadcast %81 : vector<1x128xf32> to vector<8x128xf32>
    %83 = arith.select %72, %82, %80 : vector<8x128xi1>, vector<8x128xf32>
    %84 = vector.shape_cast %70 : vector<1x128xf32> to vector<1x128xf32>
    %85 = vector.broadcast %84 : vector<1x128xf32> to vector<8x128xf32>
    %86 = arith.select %69, %85, %83 : vector<8x128xi1>, vector<8x128xf32>
    %cst_27 = arith.constant 1.000000e+00 : f32
    %87 = vector.broadcast %cst_27 : f32 to vector<8x128xf32>
    %88 = arith.select %67, %87, %86 : vector<8x128xi1>, vector<8x128xf32>
    %89 = vector.extract_strided_slice %64 {offsets = [0, 0], sizes = [128, 1], strides = [1, 1]} : vector<128x8xf32> to vector<128x1xf32>
    %cst_28 = arith.constant 0.000000e+00 : f32
    %90 = vector.broadcast %cst_28 : f32 to vector<1x128xf32>
    %cst_29 = arith.constant dense<0.000000e+00> : vector<128x128xf32>
    %91 = tpu.matmul %41, %88, %cst_29 {dimension_numbers = #tpu.dot_dimension_numbers<[1], [0], [0], [1], [0, 0, 1, 1], [], []>} : vector<128x8xf32>, vector<8x128xf32>, vector<128x128xf32> -> vector<128x128xf32>
    %92 = tpu.reciprocal %91 {approx = true} : vector<128x128xf32> -> vector<128x128xf32>
    %93 = vector.broadcast %89 : vector<128x1xf32> to vector<128x128xf32>
    %94 = arith.mulf %92, %93 : vector<128x128xf32>
    %cst_30 = arith.constant dense<0.000000e+00> : vector<128xf32>
    %95 = vector.multi_reduction <add>, %94, %cst_30 [0] : vector<128x128xf32> to vector<128xf32>
    %96 = vector.shape_cast %95 : vector<128xf32> to vector<1x128xf32>
    %97 = arith.addf %90, %96 : vector<1x128xf32>
    %c0_31 = arith.constant 0 : index
    %c0_32 = arith.constant 0 : index
    %98 = vector.load %arg4[%c0_31, %c0_32] : memref<8x128xf32, #tpu.memory_space<vmem>>, vector<1x128xf32>
    %99 = arith.addf %97, %98 : vector<1x128xf32>
    %c0_33 = arith.constant 0 : index
    %c0_34 = arith.constant 0 : index
    %100 = vector.load %arg5[%c0_33, %c0_34] : memref<8x128xf32, #tpu.memory_space<vmem>>, vector<1x128xf32>
    tpu.vector_store %arg5[%c0_33, %c0_34], %99 {strides = array<i32>} : memref<8x128xf32, #tpu.memory_space<vmem>>, vector<1x128xf32>,
    %c0_i32_35 = arith.constant 0 : i32
    %101 = vector.broadcast %c0_i32_35 : i32 to vector<8x128xi32>
    %102 = arith.cmpi eq, %65, %101 : vector<8x128xi32>
    %c1_i32_36 = arith.constant 1 : i32
    %103 = vector.broadcast %c1_i32_36 : i32 to vector<8x128xi32>
    %104 = arith.cmpi eq, %65, %103 : vector<8x128xi32>
    %105 = vector.extract_strided_slice %51 {offsets = [1, 0], sizes = [1, 128], strides = [1, 1]} : vector<8x128xf32> to vector<1x128xf32>
    %c2_i32_37 = arith.constant 2 : i32
    %106 = vector.broadcast %c2_i32_37 : i32 to vector<8x128xi32>
    %107 = arith.cmpi eq, %65, %106 : vector<8x128xi32>
    %108 = vector.extract_strided_slice %61 {offsets = [1, 0], sizes = [1, 128], strides = [1, 1]} : vector<8x128xf32> to vector<1x128xf32>
    %c3_i32_38 = arith.constant 3 : i32
    %109 = vector.broadcast %c3_i32_38 : i32 to vector<8x128xi32>
    %110 = arith.cmpi eq, %65, %109 : vector<8x128xi32>
    %111 = vector.extract_strided_slice %62 {offsets = [1, 0], sizes = [1, 128], strides = [1, 1]} : vector<8x128xf32> to vector<1x128xf32>
    %cst_39 = arith.constant 0.000000e+00 : f32
    %112 = vector.shape_cast %111 : vector<1x128xf32> to vector<1x128xf32>
    %113 = vector.broadcast %112 : vector<1x128xf32> to vector<8x128xf32>
    %114 = vector.broadcast %cst_39 : f32 to vector<8x128xf32>
    %115 = arith.select %110, %113, %114 : vector<8x128xi1>, vector<8x128xf32>
    %116 = vector.shape_cast %108 : vector<1x128xf32> to vector<1x128xf32>
    %117 = vector.broadcast %116 : vector<1x128xf32> to vector<8x128xf32>
    %118 = arith.select %107, %117, %115 : vector<8x128xi1>, vector<8x128xf32>
    %119 = vector.shape_cast %105 : vector<1x128xf32> to vector<1x128xf32>
    %120 = vector.broadcast %119 : vector<1x128xf32> to vector<8x128xf32>
    %121 = arith.select %104, %120, %118 : vector<8x128xi1>, vector<8x128xf32>
    %cst_40 = arith.constant 1.000000e+00 : f32
    %122 = vector.broadcast %cst_40 : f32 to vector<8x128xf32>
    %123 = arith.select %102, %122, %121 : vector<8x128xi1>, vector<8x128xf32>
    %124 = vector.extract_strided_slice %64 {offsets = [0, 1], sizes = [128, 1], strides = [1, 1]} : vector<128x8xf32> to vector<128x1xf32>
    %cst_41 = arith.constant 0.000000e+00 : f32
    %125 = vector.broadcast %cst_41 : f32 to vector<1x128xf32>
    %cst_42 = arith.constant dense<0.000000e+00> : vector<128x128xf32>
    %126 = tpu.matmul %41, %123, %cst_42 {dimension_numbers = #tpu.dot_dimension_numbers<[1], [0], [0], [1], [0, 0, 1, 1], [], []>} : vector<128x8xf32>, vector<8x128xf32>, vector<128x128xf32> -> vector<128x128xf32>
    %127 = tpu.reciprocal %126 {approx = true} : vector<128x128xf32> -> vector<128x128xf32>
    %128 = vector.broadcast %124 : vector<128x1xf32> to vector<128x128xf32>
    %129 = arith.mulf %127, %128 : vector<128x128xf32>
    %cst_43 = arith.constant dense<0.000000e+00> : vector<128xf32>
    %130 = vector.multi_reduction <add>, %129, %cst_43 [0] : vector<128x128xf32> to vector<128xf32>
    %131 = vector.shape_cast %130 : vector<128xf32> to vector<1x128xf32>
    %132 = arith.addf %125, %131 : vector<1x128xf32>
    %c1 = arith.constant 1 : index
    %c0_44 = arith.constant 0 : index
    %133 = vector.load %arg4[%c1, %c0_44] : memref<8x128xf32, #tpu.memory_space<vmem>>, vector<1x128xf32>
    %134 = arith.addf %132, %133 : vector<1x128xf32>
    %c1_45 = arith.constant 1 : index
    %c0_46 = arith.constant 0 : index
    %135 = vector.load %arg5[%c1_45, %c0_46] : memref<8x128xf32, #tpu.memory_space<vmem>>, vector<1x128xf32>
    tpu.vector_store %arg5[%c1_45, %c0_46], %134 {strides = array<i32>} : memref<8x128xf32, #tpu.memory_space<vmem>>, vector<1x128xf32>,
    %c0_i32_47 = arith.constant 0 : i32
    %136 = vector.broadcast %c0_i32_47 : i32 to vector<8x128xi32>
    %137 = arith.cmpi eq, %65, %136 : vector<8x128xi32>
    %c1_i32_48 = arith.constant 1 : i32
    %138 = vector.broadcast %c1_i32_48 : i32 to vector<8x128xi32>
    %139 = arith.cmpi eq, %65, %138 : vector<8x128xi32>
    %140 = vector.extract_strided_slice %51 {offsets = [2, 0], sizes = [1, 128], strides = [1, 1]} : vector<8x128xf32> to vector<1x128xf32>
    %c2_i32_49 = arith.constant 2 : i32
    %141 = vector.broadcast %c2_i32_49 : i32 to vector<8x128xi32>
    %142 = arith.cmpi eq, %65, %141 : vector<8x128xi32>
    %143 = vector.extract_strided_slice %61 {offsets = [2, 0], sizes = [1, 128], strides = [1, 1]} : vector<8x128xf32> to vector<1x128xf32>
    %c3_i32_50 = arith.constant 3 : i32
    %144 = vector.broadcast %c3_i32_50 : i32 to vector<8x128xi32>
    %145 = arith.cmpi eq, %65, %144 : vector<8x128xi32>
    %146 = vector.extract_strided_slice %62 {offsets = [2, 0], sizes = [1, 128], strides = [1, 1]} : vector<8x128xf32> to vector<1x128xf32>
    %cst_51 = arith.constant 0.000000e+00 : f32
    %147 = vector.shape_cast %146 : vector<1x128xf32> to vector<1x128xf32>
    %148 = vector.broadcast %147 : vector<1x128xf32> to vector<8x128xf32>
    %149 = vector.broadcast %cst_51 : f32 to vector<8x128xf32>
    %150 = arith.select %145, %148, %149 : vector<8x128xi1>, vector<8x128xf32>
    %151 = vector.shape_cast %143 : vector<1x128xf32> to vector<1x128xf32>
    %152 = vector.broadcast %151 : vector<1x128xf32> to vector<8x128xf32>
    %153 = arith.select %142, %152, %150 : vector<8x128xi1>, vector<8x128xf32>
    %154 = vector.shape_cast %140 : vector<1x128xf32> to vector<1x128xf32>
    %155 = vector.broadcast %154 : vector<1x128xf32> to vector<8x128xf32>
    %156 = arith.select %139, %155, %153 : vector<8x128xi1>, vector<8x128xf32>
    %cst_52 = arith.constant 1.000000e+00 : f32
    %157 = vector.broadcast %cst_52 : f32 to vector<8x128xf32>
    %158 = arith.select %137, %157, %156 : vector<8x128xi1>, vector<8x128xf32>
    %159 = vector.extract_strided_slice %64 {offsets = [0, 2], sizes = [128, 1], strides = [1, 1]} : vector<128x8xf32> to vector<128x1xf32>
    %cst_53 = arith.constant 0.000000e+00 : f32
    %160 = vector.broadcast %cst_53 : f32 to vector<1x128xf32>
    %cst_54 = arith.constant dense<0.000000e+00> : vector<128x128xf32>
    %161 = tpu.matmul %41, %158, %cst_54 {dimension_numbers = #tpu.dot_dimension_numbers<[1], [0], [0], [1], [0, 0, 1, 1], [], []>} : vector<128x8xf32>, vector<8x128xf32>, vector<128x128xf32> -> vector<128x128xf32>
    %162 = tpu.reciprocal %161 {approx = true} : vector<128x128xf32> -> vector<128x128xf32>
    %163 = vector.broadcast %159 : vector<128x1xf32> to vector<128x128xf32>
    %164 = arith.mulf %162, %163 : vector<128x128xf32>
    %cst_55 = arith.constant dense<0.000000e+00> : vector<128xf32>
    %165 = vector.multi_reduction <add>, %164, %cst_55 [0] : vector<128x128xf32> to vector<128xf32>
    %166 = vector.shape_cast %165 : vector<128xf32> to vector<1x128xf32>
    %167 = arith.addf %160, %166 : vector<1x128xf32>
    %c2 = arith.constant 2 : index
    %c0_56 = arith.constant 0 : index
    %168 = vector.load %arg4[%c2, %c0_56] : memref<8x128xf32, #tpu.memory_space<vmem>>, vector<1x128xf32>
    %169 = arith.addf %167, %168 : vector<1x128xf32>
    %c2_57 = arith.constant 2 : index
    %c0_58 = arith.constant 0 : index
    %170 = vector.load %arg5[%c2_57, %c0_58] : memref<8x128xf32, #tpu.memory_space<vmem>>, vector<1x128xf32>
    tpu.vector_store %arg5[%c2_57, %c0_58], %169 {strides = array<i32>} : memref<8x128xf32, #tpu.memory_space<vmem>>, vector<1x128xf32>,
    %c0_i32_59 = arith.constant 0 : i32
    %171 = vector.broadcast %c0_i32_59 : i32 to vector<8x128xi32>
    %172 = arith.cmpi eq, %65, %171 : vector<8x128xi32>
    %c1_i32_60 = arith.constant 1 : i32
    %173 = vector.broadcast %c1_i32_60 : i32 to vector<8x128xi32>
    %174 = arith.cmpi eq, %65, %173 : vector<8x128xi32>
    %175 = vector.extract_strided_slice %51 {offsets = [3, 0], sizes = [1, 128], strides = [1, 1]} : vector<8x128xf32> to vector<1x128xf32>
    %c2_i32_61 = arith.constant 2 : i32
    %176 = vector.broadcast %c2_i32_61 : i32 to vector<8x128xi32>
    %177 = arith.cmpi eq, %65, %176 : vector<8x128xi32>
    %178 = vector.extract_strided_slice %61 {offsets = [3, 0], sizes = [1, 128], strides = [1, 1]} : vector<8x128xf32> to vector<1x128xf32>
    %c3_i32_62 = arith.constant 3 : i32
    %179 = vector.broadcast %c3_i32_62 : i32 to vector<8x128xi32>
    %180 = arith.cmpi eq, %65, %179 : vector<8x128xi32>
    %181 = vector.extract_strided_slice %62 {offsets = [3, 0], sizes = [1, 128], strides = [1, 1]} : vector<8x128xf32> to vector<1x128xf32>
    %cst_63 = arith.constant 0.000000e+00 : f32
    %182 = vector.shape_cast %181 : vector<1x128xf32> to vector<1x128xf32>
    %183 = vector.broadcast %182 : vector<1x128xf32> to vector<8x128xf32>
    %184 = vector.broadcast %cst_63 : f32 to vector<8x128xf32>
    %185 = arith.select %180, %183, %184 : vector<8x128xi1>, vector<8x128xf32>
    %186 = vector.shape_cast %178 : vector<1x128xf32> to vector<1x128xf32>
    %187 = vector.broadcast %186 : vector<1x128xf32> to vector<8x128xf32>
    %188 = arith.select %177, %187, %185 : vector<8x128xi1>, vector<8x128xf32>
    %189 = vector.shape_cast %175 : vector<1x128xf32> to vector<1x128xf32>
    %190 = vector.broadcast %189 : vector<1x128xf32> to vector<8x128xf32>
    %191 = arith.select %174, %190, %188 : vector<8x128xi1>, vector<8x128xf32>
    %cst_64 = arith.constant 1.000000e+00 : f32
    %192 = vector.broadcast %cst_64 : f32 to vector<8x128xf32>
    %193 = arith.select %172, %192, %191 : vector<8x128xi1>, vector<8x128xf32>
    %194 = vector.extract_strided_slice %64 {offsets = [0, 3], sizes = [128, 1], strides = [1, 1]} : vector<128x8xf32> to vector<128x1xf32>
    %cst_65 = arith.constant 0.000000e+00 : f32
    %195 = vector.broadcast %cst_65 : f32 to vector<1x128xf32>
    %cst_66 = arith.constant dense<0.000000e+00> : vector<128x128xf32>
    %196 = tpu.matmul %41, %193, %cst_66 {dimension_numbers = #tpu.dot_dimension_numbers<[1], [0], [0], [1], [0, 0, 1, 1], [], []>} : vector<128x8xf32>, vector<8x128xf32>, vector<128x128xf32> -> vector<128x128xf32>
    %197 = tpu.reciprocal %196 {approx = true} : vector<128x128xf32> -> vector<128x128xf32>
    %198 = vector.broadcast %194 : vector<128x1xf32> to vector<128x128xf32>
    %199 = arith.mulf %197, %198 : vector<128x128xf32>
    %cst_67 = arith.constant dense<0.000000e+00> : vector<128xf32>
    %200 = vector.multi_reduction <add>, %199, %cst_67 [0] : vector<128x128xf32> to vector<128xf32>
    %201 = vector.shape_cast %200 : vector<128xf32> to vector<1x128xf32>
    %202 = arith.addf %195, %201 : vector<1x128xf32>
    %c3 = arith.constant 3 : index
    %c0_68 = arith.constant 0 : index
    %203 = vector.load %arg4[%c3, %c0_68] : memref<8x128xf32, #tpu.memory_space<vmem>>, vector<1x128xf32>
    %204 = arith.addf %202, %203 : vector<1x128xf32>
    %c3_69 = arith.constant 3 : index
    %c0_70 = arith.constant 0 : index
    %205 = vector.load %arg5[%c3_69, %c0_70] : memref<8x128xf32, #tpu.memory_space<vmem>>, vector<1x128xf32>
    tpu.vector_store %arg5[%c3_69, %c0_70], %204 {strides = array<i32>} : memref<8x128xf32, #tpu.memory_space<vmem>>, vector<1x128xf32>,
    %c0_i32_71 = arith.constant 0 : i32
    %206 = vector.broadcast %c0_i32_71 : i32 to vector<8x128xi32>
    %207 = arith.cmpi eq, %65, %206 : vector<8x128xi32>
    %c1_i32_72 = arith.constant 1 : i32
    %208 = vector.broadcast %c1_i32_72 : i32 to vector<8x128xi32>
    %209 = arith.cmpi eq, %65, %208 : vector<8x128xi32>
    %210 = vector.extract_strided_slice %51 {offsets = [4, 0], sizes = [1, 128], strides = [1, 1]} : vector<8x128xf32> to vector<1x128xf32>
    %c2_i32_73 = arith.constant 2 : i32
    %211 = vector.broadcast %c2_i32_73 : i32 to vector<8x128xi32>
    %212 = arith.cmpi eq, %65, %211 : vector<8x128xi32>
    %213 = vector.extract_strided_slice %61 {offsets = [4, 0], sizes = [1, 128], strides = [1, 1]} : vector<8x128xf32> to vector<1x128xf32>
    %c3_i32_74 = arith.constant 3 : i32
    %214 = vector.broadcast %c3_i32_74 : i32 to vector<8x128xi32>
    %215 = arith.cmpi eq, %65, %214 : vector<8x128xi32>
    %216 = vector.extract_strided_slice %62 {offsets = [4, 0], sizes = [1, 128], strides = [1, 1]} : vector<8x128xf32> to vector<1x128xf32>
    %cst_75 = arith.constant 0.000000e+00 : f32
    %217 = vector.shape_cast %216 : vector<1x128xf32> to vector<1x128xf32>
    %218 = vector.broadcast %217 : vector<1x128xf32> to vector<8x128xf32>
    %219 = vector.broadcast %cst_75 : f32 to vector<8x128xf32>
    %220 = arith.select %215, %218, %219 : vector<8x128xi1>, vector<8x128xf32>
    %221 = vector.shape_cast %213 : vector<1x128xf32> to vector<1x128xf32>
    %222 = vector.broadcast %221 : vector<1x128xf32> to vector<8x128xf32>
    %223 = arith.select %212, %222, %220 : vector<8x128xi1>, vector<8x128xf32>
    %224 = vector.shape_cast %210 : vector<1x128xf32> to vector<1x128xf32>
    %225 = vector.broadcast %224 : vector<1x128xf32> to vector<8x128xf32>
    %226 = arith.select %209, %225, %223 : vector<8x128xi1>, vector<8x128xf32>
    %cst_76 = arith.constant 1.000000e+00 : f32
    %227 = vector.broadcast %cst_76 : f32 to vector<8x128xf32>
    %228 = arith.select %207, %227, %226 : vector<8x128xi1>, vector<8x128xf32>
    %229 = vector.extract_strided_slice %64 {offsets = [0, 4], sizes = [128, 1], strides = [1, 1]} : vector<128x8xf32> to vector<128x1xf32>
    %cst_77 = arith.constant 0.000000e+00 : f32
    %230 = vector.broadcast %cst_77 : f32 to vector<1x128xf32>
    %cst_78 = arith.constant dense<0.000000e+00> : vector<128x128xf32>
    %231 = tpu.matmul %41, %228, %cst_78 {dimension_numbers = #tpu.dot_dimension_numbers<[1], [0], [0], [1], [0, 0, 1, 1], [], []>} : vector<128x8xf32>, vector<8x128xf32>, vector<128x128xf32> -> vector<128x128xf32>
    %232 = tpu.reciprocal %231 {approx = true} : vector<128x128xf32> -> vector<128x128xf32>
    %233 = vector.broadcast %229 : vector<128x1xf32> to vector<128x128xf32>
    %234 = arith.mulf %232, %233 : vector<128x128xf32>
    %cst_79 = arith.constant dense<0.000000e+00> : vector<128xf32>
    %235 = vector.multi_reduction <add>, %234, %cst_79 [0] : vector<128x128xf32> to vector<128xf32>
    %236 = vector.shape_cast %235 : vector<128xf32> to vector<1x128xf32>
    %237 = arith.addf %230, %236 : vector<1x128xf32>
    %c4 = arith.constant 4 : index
    %c0_80 = arith.constant 0 : index
    %238 = vector.load %arg4[%c4, %c0_80] : memref<8x128xf32, #tpu.memory_space<vmem>>, vector<1x128xf32>
    %239 = arith.addf %237, %238 : vector<1x128xf32>
    %c4_81 = arith.constant 4 : index
    %c0_82 = arith.constant 0 : index
    %240 = vector.load %arg5[%c4_81, %c0_82] : memref<8x128xf32, #tpu.memory_space<vmem>>, vector<1x128xf32>
    tpu.vector_store %arg5[%c4_81, %c0_82], %239 {strides = array<i32>} : memref<8x128xf32, #tpu.memory_space<vmem>>, vector<1x128xf32>,
    %c0_i32_83 = arith.constant 0 : i32
    %241 = vector.broadcast %c0_i32_83 : i32 to vector<8x128xi32>
    %242 = arith.cmpi eq, %65, %241 : vector<8x128xi32>
    %c1_i32_84 = arith.constant 1 : i32
    %243 = vector.broadcast %c1_i32_84 : i32 to vector<8x128xi32>
    %244 = arith.cmpi eq, %65, %243 : vector<8x128xi32>
    %245 = vector.extract_strided_slice %51 {offsets = [5, 0], sizes = [1, 128], strides = [1, 1]} : vector<8x128xf32> to vector<1x128xf32>
    %c2_i32_85 = arith.constant 2 : i32
    %246 = vector.broadcast %c2_i32_85 : i32 to vector<8x128xi32>
    %247 = arith.cmpi eq, %65, %246 : vector<8x128xi32>
    %248 = vector.extract_strided_slice %61 {offsets = [5, 0], sizes = [1, 128], strides = [1, 1]} : vector<8x128xf32> to vector<1x128xf32>
    %c3_i32_86 = arith.constant 3 : i32
    %249 = vector.broadcast %c3_i32_86 : i32 to vector<8x128xi32>
    %250 = arith.cmpi eq, %65, %249 : vector<8x128xi32>
    %251 = vector.extract_strided_slice %62 {offsets = [5, 0], sizes = [1, 128], strides = [1, 1]} : vector<8x128xf32> to vector<1x128xf32>
    %cst_87 = arith.constant 0.000000e+00 : f32
    %252 = vector.shape_cast %251 : vector<1x128xf32> to vector<1x128xf32>
    %253 = vector.broadcast %252 : vector<1x128xf32> to vector<8x128xf32>
    %254 = vector.broadcast %cst_87 : f32 to vector<8x128xf32>
    %255 = arith.select %250, %253, %254 : vector<8x128xi1>, vector<8x128xf32>
    %256 = vector.shape_cast %248 : vector<1x128xf32> to vector<1x128xf32>
    %257 = vector.broadcast %256 : vector<1x128xf32> to vector<8x128xf32>
    %258 = arith.select %247, %257, %255 : vector<8x128xi1>, vector<8x128xf32>
    %259 = vector.shape_cast %245 : vector<1x128xf32> to vector<1x128xf32>
    %260 = vector.broadcast %259 : vector<1x128xf32> to vector<8x128xf32>
    %261 = arith.select %244, %260, %258 : vector<8x128xi1>, vector<8x128xf32>
    %cst_88 = arith.constant 1.000000e+00 : f32
    %262 = vector.broadcast %cst_88 : f32 to vector<8x128xf32>
    %263 = arith.select %242, %262, %261 : vector<8x128xi1>, vector<8x128xf32>
    %264 = vector.extract_strided_slice %64 {offsets = [0, 5], sizes = [128, 1], strides = [1, 1]} : vector<128x8xf32> to vector<128x1xf32>
    %cst_89 = arith.constant 0.000000e+00 : f32
    %265 = vector.broadcast %cst_89 : f32 to vector<1x128xf32>
    %cst_90 = arith.constant dense<0.000000e+00> : vector<128x128xf32>
    %266 = tpu.matmul %41, %263, %cst_90 {dimension_numbers = #tpu.dot_dimension_numbers<[1], [0], [0], [1], [0, 0, 1, 1], [], []>} : vector<128x8xf32>, vector<8x128xf32>, vector<128x128xf32> -> vector<128x128xf32>
    %267 = tpu.reciprocal %266 {approx = true} : vector<128x128xf32> -> vector<128x128xf32>
    %268 = vector.broadcast %264 : vector<128x1xf32> to vector<128x128xf32>
    %269 = arith.mulf %267, %268 : vector<128x128xf32>
    %cst_91 = arith.constant dense<0.000000e+00> : vector<128xf32>
    %270 = vector.multi_reduction <add>, %269, %cst_91 [0] : vector<128x128xf32> to vector<128xf32>
    %271 = vector.shape_cast %270 : vector<128xf32> to vector<1x128xf32>
    %272 = arith.addf %265, %271 : vector<1x128xf32>
    %c5 = arith.constant 5 : index
    %c0_92 = arith.constant 0 : index
    %273 = vector.load %arg4[%c5, %c0_92] : memref<8x128xf32, #tpu.memory_space<vmem>>, vector<1x128xf32>
    %274 = arith.addf %272, %273 : vector<1x128xf32>
    %c5_93 = arith.constant 5 : index
    %c0_94 = arith.constant 0 : index
    %275 = vector.load %arg5[%c5_93, %c0_94] : memref<8x128xf32, #tpu.memory_space<vmem>>, vector<1x128xf32>
    tpu.vector_store %arg5[%c5_93, %c0_94], %274 {strides = array<i32>} : memref<8x128xf32, #tpu.memory_space<vmem>>, vector<1x128xf32>,
    %c0_i32_95 = arith.constant 0 : i32
    %276 = vector.broadcast %c0_i32_95 : i32 to vector<8x128xi32>
    %277 = arith.cmpi eq, %65, %276 : vector<8x128xi32>
    %c1_i32_96 = arith.constant 1 : i32
    %278 = vector.broadcast %c1_i32_96 : i32 to vector<8x128xi32>
    %279 = arith.cmpi eq, %65, %278 : vector<8x128xi32>
    %280 = vector.extract_strided_slice %51 {offsets = [6, 0], sizes = [1, 128], strides = [1, 1]} : vector<8x128xf32> to vector<1x128xf32>
    %c2_i32_97 = arith.constant 2 : i32
    %281 = vector.broadcast %c2_i32_97 : i32 to vector<8x128xi32>
    %282 = arith.cmpi eq, %65, %281 : vector<8x128xi32>
    %283 = vector.extract_strided_slice %61 {offsets = [6, 0], sizes = [1, 128], strides = [1, 1]} : vector<8x128xf32> to vector<1x128xf32>
    %c3_i32_98 = arith.constant 3 : i32
    %284 = vector.broadcast %c3_i32_98 : i32 to vector<8x128xi32>
    %285 = arith.cmpi eq, %65, %284 : vector<8x128xi32>
    %286 = vector.extract_strided_slice %62 {offsets = [6, 0], sizes = [1, 128], strides = [1, 1]} : vector<8x128xf32> to vector<1x128xf32>
    %cst_99 = arith.constant 0.000000e+00 : f32
    %287 = vector.shape_cast %286 : vector<1x128xf32> to vector<1x128xf32>
    %288 = vector.broadcast %287 : vector<1x128xf32> to vector<8x128xf32>
    %289 = vector.broadcast %cst_99 : f32 to vector<8x128xf32>
    %290 = arith.select %285, %288, %289 : vector<8x128xi1>, vector<8x128xf32>
    %291 = vector.shape_cast %283 : vector<1x128xf32> to vector<1x128xf32>
    %292 = vector.broadcast %291 : vector<1x128xf32> to vector<8x128xf32>
    %293 = arith.select %282, %292, %290 : vector<8x128xi1>, vector<8x128xf32>
    %294 = vector.shape_cast %280 : vector<1x128xf32> to vector<1x128xf32>
    %295 = vector.broadcast %294 : vector<1x128xf32> to vector<8x128xf32>
    %296 = arith.select %279, %295, %293 : vector<8x128xi1>, vector<8x128xf32>
    %cst_100 = arith.constant 1.000000e+00 : f32
    %297 = vector.broadcast %cst_100 : f32 to vector<8x128xf32>
    %298 = arith.select %277, %297, %296 : vector<8x128xi1>, vector<8x128xf32>
    %299 = vector.extract_strided_slice %64 {offsets = [0, 6], sizes = [128, 1], strides = [1, 1]} : vector<128x8xf32> to vector<128x1xf32>
    %cst_101 = arith.constant 0.000000e+00 : f32
    %300 = vector.broadcast %cst_101 : f32 to vector<1x128xf32>
    %cst_102 = arith.constant dense<0.000000e+00> : vector<128x128xf32>
    %301 = tpu.matmul %41, %298, %cst_102 {dimension_numbers = #tpu.dot_dimension_numbers<[1], [0], [0], [1], [0, 0, 1, 1], [], []>} : vector<128x8xf32>, vector<8x128xf32>, vector<128x128xf32> -> vector<128x128xf32>
    %302 = tpu.reciprocal %301 {approx = true} : vector<128x128xf32> -> vector<128x128xf32>
    %303 = vector.broadcast %299 : vector<128x1xf32> to vector<128x128xf32>
    %304 = arith.mulf %302, %303 : vector<128x128xf32>
    %cst_103 = arith.constant dense<0.000000e+00> : vector<128xf32>
    %305 = vector.multi_reduction <add>, %304, %cst_103 [0] : vector<128x128xf32> to vector<128xf32>
    %306 = vector.shape_cast %305 : vector<128xf32> to vector<1x128xf32>
    %307 = arith.addf %300, %306 : vector<1x128xf32>
    %c6 = arith.constant 6 : index
    %c0_104 = arith.constant 0 : index
    %308 = vector.load %arg4[%c6, %c0_104] : memref<8x128xf32, #tpu.memory_space<vmem>>, vector<1x128xf32>
    %309 = arith.addf %307, %308 : vector<1x128xf32>
    %c6_105 = arith.constant 6 : index
    %c0_106 = arith.constant 0 : index
    %310 = vector.load %arg5[%c6_105, %c0_106] : memref<8x128xf32, #tpu.memory_space<vmem>>, vector<1x128xf32>
    tpu.vector_store %arg5[%c6_105, %c0_106], %309 {strides = array<i32>} : memref<8x128xf32, #tpu.memory_space<vmem>>, vector<1x128xf32>,
    %c0_i32_107 = arith.constant 0 : i32
    %311 = vector.broadcast %c0_i32_107 : i32 to vector<8x128xi32>
    %312 = arith.cmpi eq, %65, %311 : vector<8x128xi32>
    %c1_i32_108 = arith.constant 1 : i32
    %313 = vector.broadcast %c1_i32_108 : i32 to vector<8x128xi32>
    %314 = arith.cmpi eq, %65, %313 : vector<8x128xi32>
    %315 = vector.extract_strided_slice %51 {offsets = [7, 0], sizes = [1, 128], strides = [1, 1]} : vector<8x128xf32> to vector<1x128xf32>
    %c2_i32_109 = arith.constant 2 : i32
    %316 = vector.broadcast %c2_i32_109 : i32 to vector<8x128xi32>
    %317 = arith.cmpi eq, %65, %316 : vector<8x128xi32>
    %318 = vector.extract_strided_slice %61 {offsets = [7, 0], sizes = [1, 128], strides = [1, 1]} : vector<8x128xf32> to vector<1x128xf32>
    %c3_i32_110 = arith.constant 3 : i32
    %319 = vector.broadcast %c3_i32_110 : i32 to vector<8x128xi32>
    %320 = arith.cmpi eq, %65, %319 : vector<8x128xi32>
    %321 = vector.extract_strided_slice %62 {offsets = [7, 0], sizes = [1, 128], strides = [1, 1]} : vector<8x128xf32> to vector<1x128xf32>
    %cst_111 = arith.constant 0.000000e+00 : f32
    %322 = vector.shape_cast %321 : vector<1x128xf32> to vector<1x128xf32>
    %323 = vector.broadcast %322 : vector<1x128xf32> to vector<8x128xf32>
    %324 = vector.broadcast %cst_111 : f32 to vector<8x128xf32>
    %325 = arith.select %320, %323, %324 : vector<8x128xi1>, vector<8x128xf32>
    %326 = vector.shape_cast %318 : vector<1x128xf32> to vector<1x128xf32>
    %327 = vector.broadcast %326 : vector<1x128xf32> to vector<8x128xf32>
    %328 = arith.select %317, %327, %325 : vector<8x128xi1>, vector<8x128xf32>
    %329 = vector.shape_cast %315 : vector<1x128xf32> to vector<1x128xf32>
    %330 = vector.broadcast %329 : vector<1x128xf32> to vector<8x128xf32>
    %331 = arith.select %314, %330, %328 : vector<8x128xi1>, vector<8x128xf32>
    %cst_112 = arith.constant 1.000000e+00 : f32
    %332 = vector.broadcast %cst_112 : f32 to vector<8x128xf32>
    %333 = arith.select %312, %332, %331 : vector<8x128xi1>, vector<8x128xf32>
    %334 = vector.extract_strided_slice %64 {offsets = [0, 7], sizes = [128, 1], strides = [1, 1]} : vector<128x8xf32> to vector<128x1xf32>
    %cst_113 = arith.constant 0.000000e+00 : f32
    %335 = vector.broadcast %cst_113 : f32 to vector<1x128xf32>
    %cst_114 = arith.constant dense<0.000000e+00> : vector<128x128xf32>
    %336 = tpu.matmul %41, %333, %cst_114 {dimension_numbers = #tpu.dot_dimension_numbers<[1], [0], [0], [1], [0, 0, 1, 1], [], []>} : vector<128x8xf32>, vector<8x128xf32>, vector<128x128xf32> -> vector<128x128xf32>
    %337 = tpu.reciprocal %336 {approx = true} : vector<128x128xf32> -> vector<128x128xf32>
    %338 = vector.broadcast %334 : vector<128x1xf32> to vector<128x128xf32>
    %339 = arith.mulf %337, %338 : vector<128x128xf32>
    %cst_115 = arith.constant dense<0.000000e+00> : vector<128xf32>
    %340 = vector.multi_reduction <add>, %339, %cst_115 [0] : vector<128x128xf32> to vector<128xf32>
    %341 = vector.shape_cast %340 : vector<128xf32> to vector<1x128xf32>
    %342 = arith.addf %335, %341 : vector<1x128xf32>
    %c7 = arith.constant 7 : index
    %c0_116 = arith.constant 0 : index
    %343 = vector.load %arg4[%c7, %c0_116] : memref<8x128xf32, #tpu.memory_space<vmem>>, vector<1x128xf32>
    %344 = arith.addf %342, %343 : vector<1x128xf32>
    %c7_117 = arith.constant 7 : index
    %c0_118 = arith.constant 0 : index
    %345 = vector.load %arg5[%c7_117, %c0_118] : memref<8x128xf32, #tpu.memory_space<vmem>>, vector<1x128xf32>
    tpu.vector_store %arg5[%c7_117, %c0_118], %344 {strides = array<i32>} : memref<8x128xf32, #tpu.memory_space<vmem>>, vector<1x128xf32>,
    return
  }
  func.func @transform_0(%arg0: i32) -> (i32, i32) {
    %c0_i32 = arith.constant 0 : i32
    %c0_i32_0 = arith.constant 0 : i32
    return %arg0, %c0_i32 : i32, i32
  }
  func.func @transform_1(%arg0: i32) -> (i32, i32) {
    %c0_i32 = arith.constant 0 : i32
    %c0_i32_0 = arith.constant 0 : i32
    return %arg0, %c0_i32 : i32, i32
  }
  func.func @transform_2(%arg0: i32) -> (i32, i32) {
    %c0_i32 = arith.constant 0 : i32
    %c0_i32_0 = arith.constant 0 : i32
    return %arg0, %c0_i32 : i32, i32
  }
  func.func @transform_3(%arg0: i32) -> (i32, i32) {
    %c0_i32 = arith.constant 0 : i32
    %c0_i32_0 = arith.constant 0 : i32
    return %arg0, %c0_i32 : i32, i32
  }
  func.func @transform_4(%arg0: i32) -> (i32, i32) {
    %c0_i32 = arith.constant 0 : i32
    %c0_i32_0 = arith.constant 0 : i32
    return %arg0, %c0_i32 : i32, i32
  }
}

</mosaic_0001>

<bundles_post_ra>
// kernel: tpu_custom_call.1
= control target key start
LH: loop header
LB: loop body
LE: loop exit
PB: predicated region body
PF: predicated region fallthrough
CT: control target
= control target key end

     0   :  { %9 = vsyncpa [#allocation3], 0  ;;  %s4999_s0 = inlined_call_operand.hbm [shape: f32[8,128], index: 0, kind: input, shape index: {}]   ;;  %s5000_s1 = inlined_call_operand.hbm [shape: f32[8,128], index: 1, kind: input, shape index: {}]   ;;  %s5001_s2 = inlined_call_operand.hbm [shape: f32[8,128], index: 2, kind: input, shape index: {}]   ;;  %s5002_s3 = inlined_call_operand.hbm [shape: f32[8,128], index: 3, kind: input, shape index: {}]   ;;  %s5003_s4 = inlined_call_operand.hbm [shape: f32[8,128], index: 4, kind: output, shape index: {}]  }
   0x1   :  { %10 = vsyncpa [#allocation6], 0 }
   0x2   :  { %11 = vsyncpa [#allocation9], 0 }
   0x3   :  { %12 = vsyncpa [#allocation4], 0  ;;  %s3784_s15 = smov [#allocation5]   ;;  %s3785_s17 = smov [#allocation2]  }
   0x4   :  { %s29_s16 = sshll.u32 %s3784_s15, 4  ;;  %s19_s18 = sshll.u32 %s3785_s17, 4  ;;  %s30_s16 = int_to_ptr.vmem [resolvable:$true] %s29_s16  ;;  %s20_s18 = int_to_ptr.vmem [resolvable:$true] %s19_s18 }
   0x5   :  { %s3684_s19 = scalar_lea.vmem %s30_s16, 128  ;;  %p3689_p1 = scmp.lt.s32.totalorder %s30_s16, %s30_s16 }
   0x6   :  { %p3685_p0 = scmp.ne.s32.totalorder %s30_s16, %s3684_s19  ;;  %p3690_p2 = scmp.lt.s32.totalorder %s3684_s19, %s3684_s19 }
   0x8   :  { %p3691_p3 = por %p3690_p2, %p3689_p1 }
   0xa   :  { %p3692_p4 = pnand %p3691_p3, %p3685_p0 }
   0xc   :  { %3695 = shalt.err (!%p3692_p4)
}
   0xd   :  { %32 = dma.hbm_to_vmem [thread:$0]  %s5000_s1, 128, %s30_s16, [#allocation6]  }
   0xe   :  { %s3704_s22 = scalar_lea.vmem %s20_s18, 128  ;;  %p3709_p6 = scmp.lt.s32.totalorder %s20_s18, %s20_s18 }
   0xf   :  { %p3705_p5 = scmp.ne.s32.totalorder %s20_s18, %s3704_s22  ;;  %p3710_p7 = scmp.lt.s32.totalorder %s3704_s22, %s3704_s22 }
  0x11   :  { %p3711_p8 = por %p3710_p7, %p3709_p6 }
  0x13   :  { %p3712_p9 = pnand %p3711_p8, %p3705_p5 }
  0x15   :  { %3715 = shalt.err (!%p3712_p9)
}
  0x16   :  { %22 = dma.hbm_to_vmem [thread:$0]  %s4999_s0, 128, %s20_s18, [#allocation3]  }
  0x17   :  { %s3786_s25 = smov [#allocation7]   ;;  %s3787_s27 = smov [#allocation8]  }
  0x18   :  { %s39_s26 = sshll.u32 %s3786_s25, 4  ;;  %s49_s28 = sshll.u32 %s3787_s27, 4  ;;  %s40_s26 = int_to_ptr.vmem [resolvable:$true] %s39_s26  ;;  %s50_s28 = int_to_ptr.vmem [resolvable:$true] %s49_s28 }
  0x19   :  { %s3724_s29 = scalar_lea.vmem %s40_s26, 128  ;;  %p3729_p11 = scmp.lt.s32.totalorder %s40_s26, %s40_s26 }
  0x1a   :  { %p3725_p10 = scmp.ne.s32.totalorder %s40_s26, %s3724_s29  ;;  %p3730_p12 = scmp.lt.s32.totalorder %s3724_s29, %s3724_s29 }
  0x1c   :  { %p3731_p13 = por %p3730_p12, %p3729_p11 }
  0x1e   :  { %p3732_p0 = pnand %p3731_p13, %p3725_p10 }
  0x20   :  { %3735 = shalt.err (!%p3732_p0)
}
  0x21   :  { %42 = dma.hbm_to_vmem [thread:$0]  %s5001_s2, 128, %s40_s26, [#allocation6]  }
  0x22   :  { %s3744_s5 = scalar_lea.vmem %s50_s28, 128  ;;  %p3749_p2 = scmp.lt.s32.totalorder %s50_s28, %s50_s28 }
  0x23   :  { %p3745_p1 = scmp.ne.s32.totalorder %s50_s28, %s3744_s5  ;;  %p3750_p3 = scmp.lt.s32.totalorder %s3744_s5, %s3744_s5 }
  0x25   :  { %p3751_p4 = por %p3750_p3, %p3749_p2 }
  0x27   :  { %p3752_p5 = pnand %p3751_p4, %p3745_p1 }
  0x29   :  { %3755 = shalt.err (!%p3752_p5)
}
  0x2a   :  { %52 = dma.hbm_to_vmem [thread:$0]  %s5002_s3, 128, %s50_s28, [#allocation9]  }
  0x2b   :  { %3776 = dma.done.wait [#allocation3], 128  }
  0x2c   :  { %3777 = vsyncadd [#allocation3], 4294967168 }
  0x2d   :  { %3778 = dma.done.wait [#allocation6], 256  }
  0x2e   :  { %3779 = vsyncadd [#allocation6], 4294967040 }
  0x2f   :  { %3780 = dma.done.wait [#allocation9], 128  }
  0x30   :  { %3781 = vsyncadd [#allocation9], 4294967168  ;;  %v65_v0 = vlaneseq  ;;  %v3788_v1 = vmov 1   ;;  %v391_v8 = vld [vmem:[#allocation2] sm:$0xff]  ;;  %v376_v9 = vld [vmem:[#allocation5] sm:$0xff]  ;;  %vm444_vm8 = vcmask 64512  }
  0x31   :  { %3304 = vset.pattern.permute.xlu1 %v3788_v1  ;;  %v383_v10 = vld [vmem:[#allocation7] sm:$0xff]  ;;  %392 = vxpose.xlu0.b32.start.end [1/1] (short) %v391_v8, 128  ;;  %v2814_v14 = vadd.f32 -63.5, %v376_v9  ;;  %s3796_s2 = smov [#allocation10]  }
  0x32   :  { %v3835_v2 = vshrl.u32 %v65_v0, 7  ;;  %v3841_v5 = vand.u32 127, %v65_v0  ;;  %v384_v15 = vsub.f32 63.5, %v383_v10  ;;  %s2755_s3 = sshll.u32 %s3796_s2, 4  ;;  %s2756_s3 = int_to_ptr.vmem [resolvable:$true] %s2755_s3 }
  0x33   :  { %v378_v22 = vmul.f32 0.5, %v2814_v14  ;;  %s3756_s7 = scalar_lea.vmem %s2756_s3, 128  ;;  %p3761_p7 = scmp.lt.s32.totalorder %s2756_s3, %s2756_s3 }
  0x34   :  { %v82_v3 = vcvt.s32.f32 %v3835_v2  ;;  %v3839_v4 = vsub.s32 0, %v3835_v2  ;;  %v67_v6 = vadd.s32 8, %v3835_v2  ;;  %v68_v7 = vadd.s32 16, %v3835_v2  ;;  %p3757_p6 = scmp.ne.s32.totalorder %s2756_s3, %s3756_s7  ;;  %p3762_p8 = scmp.lt.s32.totalorder %s3756_s7, %s3756_s7 }
  0x35   :  { %v69_v13 = vadd.s32 24, %v3835_v2  ;;  %v3847_v21 = vsub.s32 1, %v3835_v2  ;;  %v385_v23 = vmul.f32 0.5, %v384_v15  ;;  %v2815_v30 = vclamps-f32 %v378_v22, 44.0 }
  0x36   :  { %v98_v11 = vsub.f32 63.5, %v82_v3  ;;  %v2782_v12 = vadd.f32 -63.5, %v82_v3  ;;  %v83_v16 = vcvt.s32.f32 %v67_v6  ;;  %v84_v17 = vcvt.s32.f32 %v68_v7  ;;  %p3763_p9 = por %p3762_p8, %p3761_p7 }
  0x37   :  { %v85_v20 = vcvt.s32.f32 %v69_v13  ;;  %v2816_v31 = vclamps-f32 %v385_v23, 44.0  ;;  %v381_v38 = vmul.f32 1.442695, %v2815_v30  ;;  %v70_v52 = vadd.s32 32, %v3835_v2 }
  0x38   :  { %v114_v18 = vmul.f32 0.5, %v98_v11  ;;  %v210_v19 = vmul.f32 0.5, %v2782_v12  ;;  %v99_v24 = vsub.f32 63.5, %v83_v16  ;;  %v2783_v25 = vadd.f32 -63.5, %v83_v16  ;;  %p3764_p10 = pnand %p3763_p9, %p3757_p6 }
  0x39   :  { %v100_v28 = vsub.f32 63.5, %v84_v17  ;;  %v2784_v29 = vadd.f32 -63.5, %v84_v17  ;;  %v388_v39 = vmul.f32 1.442695, %v2816_v31  ;;  %v101_v44 = vsub.f32 63.5, %v85_v20 }
  0x3a   :  { %v2766_v26 = vclamps-f32 %v114_v18, 44.0  ;;  %v2798_v27 = vclamps-f32 %v210_v19, 44.0  ;;  %v115_v32 = vmul.f32 0.5, %v99_v24  ;;  %v211_v33 = vmul.f32 0.5, %v2783_v25 }
  0x3b   :  { %v116_v36 = vmul.f32 0.5, %v100_v28  ;;  %v212_v37 = vmul.f32 0.5, %v2784_v29  ;;  %v2785_v47 = vadd.f32 -63.5, %v85_v20  ;;  %v117_v50 = vmul.f32 0.5, %v101_v44 }
  0x3c   :  { %v162_v34 = vmul.f32 1.442695, %v2766_v26  ;;  %v258_v35 = vmul.f32 1.442695, %v2798_v27  ;;  %v2767_v40 = vclamps-f32 %v115_v32, 44.0  ;;  %v2799_v41 = vclamps-f32 %v211_v33, 44.0 }
  0x3d   :  { %v2768_v42 = vclamps-f32 %v116_v36, 44.0  ;;  %v2800_v43 = vclamps-f32 %v212_v37, 44.0  ;;  %v213_v51 = vmul.f32 0.5, %v2785_v47  ;;  %v71_v53 = vadd.s32 40, %v3835_v2 }
  0x3e   :  { %3352 = vpow2.f32 %v162_v34  ;;  %v164_v45 = vmul.f32 1.442695, %v2767_v40  ;;  %v260_v46 = vmul.f32 1.442695, %v2799_v41  ;;  %v2769_v54 = vclamps-f32 %v117_v50, 44.0 }
  0x3f   :  { %3354 = vpow2.f32 %v381_v38  ;;  %v166_v48 = vmul.f32 1.442695, %v2768_v42  ;;  %v262_v49 = vmul.f32 1.442695, %v2800_v43  ;;  %v72_v55 = vadd.s32 48, %v3835_v2 }
  0x40   :  { %3356 = vpow2.f32 %v388_v39  ;;  %v73_v56 = vadd.s32 56, %v3835_v2  ;;  %v2801_v57 = vclamps-f32 %v213_v51, 44.0  ;;  %v86_v58 = vcvt.s32.f32 %v70_v52 }
  0x41   :  { %3358 = vpow2.f32 %v258_v35  ;;  %v87_v59 = vcvt.s32.f32 %v71_v53  ;;  %v168_v60 = vmul.f32 1.442695, %v2769_v54  ;;  %v88_v61 = vcvt.s32.f32 %v72_v55 }
  0x42   :  { %3360 = vpow2.f32 %v164_v45  ;;  %v89_v62 = vcvt.s32.f32 %v73_v56  ;;  %v264_v63 = vmul.f32 1.442695, %v2801_v57  ;;  %v102_v0 = vsub.f32 63.5, %v86_v58 }
  0x43   :  { %3362 = vpow2.f32 %v260_v46  ;;  %v2786_v3 = vadd.f32 -63.5, %v86_v58  ;;  %vm295_vm0 = vcmp.eq.s32.totalorder %v3841_v5, 3  ;;  %v103_v6 = vsub.f32 63.5, %v87_v59 }
  0x44   :  { %3364 = vpow2.f32 %v166_v48  ;;  %v2787_v7 = vadd.f32 -63.5, %v87_v59  ;;  %v104_v8 = vsub.f32 63.5, %v88_v61  ;;  %vm427_vm1 = vcmp.eq.s32.totalorder %v3835_v2, 3 }
  0x45   :  { %3366 = vpow2.f32 %v262_v49  ;;  %vm294_vm2 = vcmp.eq.s32.totalorder %v3841_v5, 2  ;;  %v118_v9 = vmul.f32 0.5, %v102_v0  ;;  %v214_v10 = vmul.f32 0.5, %v2786_v3 }
  0x46   :  { %3368 = vpow2.f32 %v168_v60  ;;  %v2788_v11 = vadd.f32 -63.5, %v88_v61  ;;  %vm426_vm3 = vcmp.eq.s32.totalorder %v3835_v2, 2  ;;  %vm293_vm4 = vcmp.eq.s32.totalorder %v3841_v5, 1 }
  0x47   :  { %3370 = vpow2.f32 %v264_v63  ;;  %v119_v12 = vmul.f32 0.5, %v103_v6  ;;  %v215_v13 = vmul.f32 0.5, %v2787_v7  ;;  %v120_v14 = vmul.f32 0.5, %v104_v8 }
  0x48   :  { %v105_v15 = vsub.f32 63.5, %v89_v62  ;;  %vm425_vm5 = vcmp.eq.s32.totalorder %v3835_v2, 1  ;;  %vm292_vm6 = vcmp.eq.s32.totalorder %v3841_v5, 0  ;;  %v2770_v16 = vclamps-f32 %v118_v9, 44.0 }
  0x49   :  { %v2802_v17 = vclamps-f32 %v214_v10, 44.0  ;;  %v216_v18 = vmul.f32 0.5, %v2788_v11  ;;  %v2789_v19 = vadd.f32 -63.5, %v89_v62  ;;  %vm424_vm7 = vcmp.eq.s32.totalorder %v3835_v2, 0 }
  0x4a   :  { %v2771_v20 = vclamps-f32 %v119_v12, 44.0  ;;  %v2803_v22 = vclamps-f32 %v215_v13, 44.0  ;;  %v2772_v23 = vclamps-f32 %v120_v14, 44.0  ;;  %v121_v24 = vmul.f32 0.5, %v105_v15 }
  0x4b   :  { %v3353_v25 = vpop.eup %3352  ;;  %v170_v26 = vmul.f32 1.442695, %v2770_v16  ;;  %v266_v27 = vmul.f32 1.442695, %v2802_v17  ;;  %v2804_v28 = vclamps-f32 %v216_v18, 44.0  ;;  %v217_v29 = vmul.f32 0.5, %v2789_v19 }
  0x4c   :  { %v3861_v30 = vpop.eup %3354  ;;  %v172_v31 = vmul.f32 1.442695, %v2771_v20  ;;  %v268_v32 = vmul.f32 1.442695, %v2803_v22  ;;  %v174_v33 = vmul.f32 1.442695, %v2772_v23 }
  0x4d   :  { %v3863_v34 = vpop.eup %3356  ;;  %v441_v35 = vrot.slane %v3861_v30, %v3839_v4  ;;  %v788_v36 = vrot.slane %v3861_v30, %v3847_v21  ;;  %3372 = vpow2.f32 %v170_v26  ;;  %v270_v37 = vmul.f32 1.442695, %v2804_v28 }
  0x4e   :  { %v3359_v38 = vpop.eup %3358  ;;  %v3871_v39 = vmul.f32 %v3863_v34, %v3861_v30  ;;  %v436_v40 = vrot.slane %v3863_v34, %v3839_v4  ;;  %v783_v41 = vrot.slane %v3863_v34, %v3847_v21  ;;  %3374 = vpow2.f32 %v266_v27 }
  0x4f   :  { %v3361_v42 = vpop.eup %3360  ;;  %v296_v43 = vmul.f32 %v3359_v38, %v3353_v25  ;;  %3376 = vpow2.f32 %v172_v31  ;;  %v2773_v44 = vclamps-f32 %v121_v24, 44.0  ;;  %v2805_v45 = vclamps-f32 %v217_v29, 44.0 }
  0x50   :  { %v3363_v46 = vpop.eup %3362  ;;  %v431_v47 = vrot.slane %v3871_v39, %v3839_v4  ;;  %v778_v48 = vrot.slane %v3871_v39, %v3847_v21  ;;  %3378 = vpow2.f32 %v268_v32  ;;  %v74_v49 = vadd.s32 64, %v3835_v2 }
  0x51   :  { %v3365_v50 = vpop.eup %3364  ;;  %v312_v51 = vsel %vm295_vm0, %v296_v43, 0.0  ;;  %v297_v52 = vmul.f32 %v3363_v46, %v3361_v42  ;;  %3380 = vpow2.f32 %v174_v33  ;;  %v176_v53 = vmul.f32 1.442695, %v2773_v44 }
  0x52   :  { %v3367_v54 = vpop.eup %3366  ;;  %v432_v55 = vsel %vm427_vm1, %v431_v47, 0.0  ;;  %v328_v4 = vsel %vm294_vm2, %v3359_v38, %v312_v51  ;;  %v779_v21 = vsel %vm427_vm1, %v778_v48, 0.0  ;;  %3382 = vpow2.f32 %v270_v37 }
  0x53   :  { %v3369_v56 = vpop.eup %3368  ;;  %v437_v57 = vsel %vm426_vm3, %v436_v40, %v432_v55  ;;  %v344_v58 = vsel %vm293_vm4, %v3353_v25, %v328_v4  ;;  %v313_v59 = vsel %vm295_vm0, %v297_v52, 0.0  ;;  %v298_v60 = vmul.f32 %v3367_v54, %v3365_v50 }
  0x54   :  { %v3371_v61 = vpop.eup %3370  ;;  %v442_v62 = vsel %vm425_vm5, %v441_v35, %v437_v57  ;;  %v3900_v63 = vsel %vm292_vm6, 1.0, %v344_v58  ;;  %v329_v0 = vsel %vm294_vm2, %v3363_v46, %v313_v59  ;;  %v784_v3 = vsel %vm426_vm3, %v783_v41, %v779_v21 }
  0x55   :  { %v443_v6 = vsel %vm424_vm7, 1.0, %v442_v62  ;;  %3083 = vmatprep.mubr.msk.f32.mxu0 %vm444_vm8, %v3900_v63  ;;  %v345_v7 = vsel %vm293_vm4, %v3361_v42, %v329_v0  ;;  %v314_v8 = vsel %vm295_vm0, %v298_v60, 0.0  ;;  %v299_v9 = vmul.f32 %v3371_v61, %v3369_v56  ;;  %3109 = vmatprep.mubr.msk.f32.mxu1 %vm444_vm8, %v3900_v63 }
  0x56   :  { %3081 = vmatprep.subr.mxu0 %v443_v6  ;;  %v3918_v10 = vsel %vm292_vm6, 1.0, %v345_v7  ;;  %v330_v11 = vsel %vm294_vm2, %v3367_v54, %v314_v8  ;;  %v789_v12 = vsel %vm425_vm5, %v788_v36, %v784_v3  ;;  %3384 = vpow2.f32 %v176_v53 }
  0x57   :  { %3082 = vmatpush3.msra.mxu0 %v443_v6  ;;  %v346_v13 = vsel %vm293_vm4, %v3365_v50, %v330_v11  ;;  %v315_v14 = vsel %vm295_vm0, %v299_v9, 0.0  ;;  %v790_v15 = vsel %vm424_vm7, 1.0, %v789_v12  ;;  %v272_v16 = vmul.f32 1.442695, %v2805_v45 }
  0x58   :  { %3084 = vmatmul.mubr.msk.f32.vlgmr.msra.gmra.mxu0 %vm444_vm8, %v3918_v10  ;;  %v3934_v17 = vsel %vm292_vm6, 1.0, %v346_v13  ;;  %v331_v18 = vsel %vm294_vm2, %v3371_v61, %v315_v14  ;;  %3107 = vmatprep.subr.mxu1 %v790_v15  ;;  %v90_v19 = vcvt.s32.f32 %v74_v49  ;;  %v75_v20 = vadd.s32 72, %v3835_v2 }
  0x59   :  { %3086 = vmatprep.mubr.msk.f32.mxu0 %vm444_vm8, %v3934_v17  ;;  %v347_v22 = vsel %vm293_vm4, %v3369_v56, %v331_v18  ;;  %3108 = vmatpush3.msra.mxu1 %v790_v15  ;;  %3386 = vpow2.f32 %v272_v16  ;;  %v76_v23 = vadd.s32 80, %v3835_v2  ;;  %v3945_v24 = vadd.s32 88, %v3835_v2 }
  0x5a   :  { %v3373_v25 = vpop.eup %3372  ;;  %v3949_v26 = vsel %vm292_vm6, 1.0, %v347_v22  ;;  %3110 = vmatmul.mubr.msk.f32.vlgmr.msra.gmra.mxu1 %vm444_vm8, %v3918_v10  ;;  %v106_v27 = vsub.f32 63.5, %v90_v19  ;;  %v2790_v28 = vadd.f32 -63.5, %v90_v19  ;;  %v91_v29 = vcvt.s32.f32 %v75_v20 }
  0x5b   :  { %v3375_v31 = vpop.eup %3374  ;;  %v92_v32 = vcvt.s32.f32 %v76_v23  ;;  %v93_v33 = vcvt.s32.f32 %v3945_v24  ;;  %v3955_v35 = vadd.s32 96, %v3835_v2  ;;  %v3958_v36 = vadd.s32 104, %v3835_v2  ;;  %3112 = vmatprep.mubr.msk.f32.mxu1 %vm444_vm8, %v3934_v17 }
  0x5c   :  { %v3377_v37 = vpop.eup %3376  ;;  %3087 = vmatmul.mubr.msk.f32.gmra.mxu0 %vm444_vm8, %v3949_v26  ;;  %v300_v38 = vmul.f32 %v3375_v31, %v3373_v25  ;;  %v122_v40 = vmul.f32 0.5, %v106_v27  ;;  %v218_v41 = vmul.f32 0.5, %v2790_v28  ;;  %v107_v42 = vsub.f32 63.5, %v91_v29 }
  0x5d   :  { %v3379_v43 = vpop.eup %3378  ;;  %v2791_v44 = vadd.f32 -63.5, %v91_v29  ;;  %v108_v45 = vsub.f32 63.5, %v92_v32  ;;  %v2792_v46 = vadd.f32 -63.5, %v92_v32  ;;  %v109_v47 = vsub.f32 63.5, %v93_v33 }
  0x5e   :  { %v3381_v48 = vpop.eup %3380  ;;  %v316_v49 = vsel %vm295_vm0, %v300_v38, 0.0  ;;  %v301_v50 = vmul.f32 %v3379_v43, %v3377_v37  ;;  %v2774_v51 = vclamps-f32 %v122_v40, 44.0  ;;  %v2806_v52 = vclamps-f32 %v218_v41, 44.0  ;;  %3113 = vmatmul.mubr.msk.f32.gmra.mxu1 %vm444_vm8, %v3949_v26 }
  0x5f   :  { %v3383_v53 = vpop.eup %3382  ;;  %v332_v54 = vsel %vm294_vm2, %v3375_v31, %v316_v49  ;;  %v123_v55 = vmul.f32 0.5, %v107_v42  ;;  %v219_v4 = vmul.f32 0.5, %v2791_v44  ;;  %v124_v21 = vmul.f32 0.5, %v108_v45 }
  0x60   :  { %v348_v56 = vsel %vm293_vm4, %v3373_v25, %v332_v54  ;;  %v317_v57 = vsel %vm295_vm0, %v301_v50, 0.0  ;;  %v302_v58 = vmul.f32 %v3383_v53, %v3381_v48  ;;  %v178_v59 = vmul.f32 1.442695, %v2774_v51 }
  0x61   :  { %v3789_v60 = vmov 0   ;;  %v3977_v61 = vsel %vm292_vm6, 1.0, %v348_v56  ;;  %v333_v62 = vsel %vm294_vm2, %v3379_v43, %v317_v57  ;;  %v274_v0 = vmul.f32 1.442695, %v2806_v52 }
  0x62   :  { %3303 = vset.pattern.permute.xlu0 %v3789_v60  ;;  %v2775_v3 = vclamps-f32 %v123_v55, 44.0  ;;  %3089 = vmatprep.mubr.msk.f32.mxu0 %vm444_vm8, %v3977_v61  ;;  %v349_v6 = vsel %vm293_vm4, %v3377_v37, %v333_v62  ;;  %v318_v7 = vsel %vm295_vm0, %v302_v58, 0.0  ;;  %3388 = vpow2.f32 %v178_v59 }
  0x63   :  { %v2807_v8 = vclamps-f32 %v219_v4, 44.0  ;;  %3115 = vmatprep.mubr.msk.f32.mxu1 %vm444_vm8, %v3977_v61  ;;  %v3385_v9 = vpop.eup %3384  ;;  %v3991_v11 = vsel %vm292_vm6, 1.0, %v349_v6  ;;  %v334_v12 = vsel %vm294_vm2, %v3383_v53, %v318_v7  ;;  %3390 = vpow2.f32 %v274_v0 }
  0x64   :  { %v180_v13 = vmul.f32 1.442695, %v2775_v3  ;;  %3090 = vmatmul.mubr.msk.f32.gmra.mxu0 %vm444_vm8, %v3991_v11  ;;  %v350_v14 = vsel %vm293_vm4, %v3381_v48, %v334_v12  ;;  %v2776_v16 = vclamps-f32 %v124_v21, 44.0  ;;  %v220_v18 = vmul.f32 0.5, %v2792_v46  ;;  %3116 = vmatmul.mubr.msk.f32.gmra.mxu1 %vm444_vm8, %v3991_v11 }
  0x65   :  { %v276_v15 = vmul.f32 1.442695, %v2807_v8  ;;  %v4003_v19 = vsel %vm292_vm6, 1.0, %v350_v14  ;;  %v125_v20 = vmul.f32 0.5, %v109_v47  ;;  %v2793_v22 = vadd.f32 -63.5, %v93_v33 }
  0x66   :  { %3392 = vpow2.f32 %v180_v13  ;;  %v3387_v23 = vpop.eup %3386  ;;  %3092 = vmatprep.mubr.msk.f32.mxu0 %vm444_vm8, %v4003_v19  ;;  %v182_v24 = vmul.f32 1.442695, %v2776_v16  ;;  %v2808_v25 = vclamps-f32 %v220_v18, 44.0  ;;  %v94_v27 = vcvt.s32.f32 %v3955_v35  ;;  %3118 = vmatprep.mubr.msk.f32.mxu1 %vm444_vm8, %v4003_v19 }
  0x67   :  { %3394 = vpow2.f32 %v276_v15  ;;  %v303_v28 = vmul.f32 %v3387_v23, %v3385_v9  ;;  %v2777_v29 = vclamps-f32 %v125_v20, 44.0  ;;  %v221_v31 = vmul.f32 0.5, %v2793_v22 }
  0x68   :  { %v95_v32 = vcvt.s32.f32 %v3958_v36  ;;  %3396 = vpow2.f32 %v182_v24  ;;  %v278_v37 = vmul.f32 1.442695, %v2808_v25  ;;  %v110_v33 = vsub.f32 63.5, %v94_v27 }
  0x69   :  { %v2794_v38 = vadd.f32 -63.5, %v94_v27  ;;  %v319_v40 = vsel %vm295_vm0, %v303_v28, 0.0  ;;  %v184_v41 = vmul.f32 1.442695, %v2777_v29  ;;  %v2809_v42 = vclamps-f32 %v221_v31, 44.0 }
  0x6a   :  { %v111_v43 = vsub.f32 63.5, %v95_v32  ;;  %v335_v35 = vsel %vm294_vm2, %v3387_v23, %v319_v40  ;;  %3398 = vpow2.f32 %v278_v37  ;;  %v126_v44 = vmul.f32 0.5, %v110_v33 }
  0x6b   :  { %v222_v45 = vmul.f32 0.5, %v2794_v38  ;;  %v351_v46 = vsel %vm293_vm4, %v3385_v9, %v335_v35  ;;  %3400 = vpow2.f32 %v184_v41  ;;  %v280_v36 = vmul.f32 1.442695, %v2809_v42 }
  0x6c   :  { %v127_v47 = vmul.f32 0.5, %v111_v43  ;;  %v4019_v48 = vsel %vm292_vm6, 1.0, %v351_v46  ;;  %v2778_v49 = vclamps-f32 %v126_v44, 44.0  ;;  %v2795_v51 = vadd.f32 -63.5, %v95_v32 }
  0x6d   :  { %v2810_v50 = vclamps-f32 %v222_v45, 44.0  ;;  %3093 = vmatmul.mubr.msk.f32.gmra.mxu0 %vm444_vm8, %v4019_v48  ;;  %3402 = vpow2.f32 %v280_v36  ;;  %v80_v53 = vadd.s32 112, %v3835_v2  ;;  %v81_v54 = vadd.s32 120, %v3835_v2  ;;  %3119 = vmatmul.mubr.msk.f32.gmra.mxu1 %vm444_vm8, %v4019_v48 }
  0x6e   :  { %v2779_v52 = vclamps-f32 %v127_v47, 44.0  ;;  %v186_v55 = vmul.f32 1.442695, %v2778_v49  ;;  %v223_v21 = vmul.f32 0.5, %v2795_v51  ;;  %v1059_v56 = vsub.s32 2, %v3835_v2 }
  0x6f   :  { %v282_v4 = vmul.f32 1.442695, %v2810_v50  ;;  %v3389_v57 = vpop.eup %3388  ;;  %v96_v59 = vcvt.s32.f32 %v80_v53  ;;  %v97_v62 = vcvt.s32.f32 %v81_v54  ;;  %v4029_v0 = vsub.s32 3, %v3835_v2 }
  0x70   :  { %v188_v58 = vmul.f32 1.442695, %v2779_v52  ;;  %v3391_v3 = vpop.eup %3390  ;;  %3404 = vpow2.f32 %v186_v55  ;;  %v2811_v6 = vclamps-f32 %v223_v21, 44.0  ;;  %v1060_v7 = vrot.slane %v3871_v39, %v1059_v56 }
  0x71   :  { %v1065_v8 = vrot.slane %v3863_v34, %v1059_v56  ;;  %v304_v9 = vmul.f32 %v3391_v3, %v3389_v57  ;;  %3406 = vpow2.f32 %v282_v4  ;;  %v112_v12 = vsub.f32 63.5, %v96_v59 }
  0x72   :  { %v2796_v13 = vadd.f32 -63.5, %v96_v59  ;;  %3408 = vpow2.f32 %v188_v58  ;;  %v284_v15 = vmul.f32 1.442695, %v2811_v6  ;;  %v113_v16 = vsub.f32 63.5, %v97_v62 }
  0x73   :  { %v3393_v14 = vpop.eup %3392  ;;  %v2797_v18 = vadd.f32 -63.5, %v97_v62  ;;  %v320_v22 = vsel %vm295_vm0, %v304_v9, 0.0  ;;  %v128_v23 = vmul.f32 0.5, %v112_v12  ;;  %v1061_v25 = vsel %vm427_vm1, %v1060_v7, 0.0 }
  0x74   :  { %v3395_v20 = vpop.eup %3394  ;;  %v224_v24 = vmul.f32 0.5, %v2796_v13  ;;  %v336_v27 = vsel %vm294_vm2, %v3391_v3, %v320_v22  ;;  %3410 = vpow2.f32 %v284_v15  ;;  %v129_v29 = vmul.f32 0.5, %v113_v16 }
  0x75   :  { %v305_v28 = vmul.f32 %v3395_v20, %v3393_v14  ;;  %v3397_v31 = vpop.eup %3396  ;;  %v352_v32 = vsel %vm293_vm4, %v3389_v57, %v336_v27  ;;  %v2780_v37 = vclamps-f32 %v128_v23, 44.0  ;;  %v225_v38 = vmul.f32 0.5, %v2797_v18 }
  0x76   :  { %v2812_v33 = vclamps-f32 %v224_v24, 44.0  ;;  %v4043_v40 = vsel %vm292_vm6, 1.0, %v352_v32  ;;  %v2781_v42 = vclamps-f32 %v129_v29, 44.0  ;;  %v1066_v43 = vsel %vm426_vm3, %v1065_v8, %v1061_v25 }
  0x77   :  { %v321_v41 = vsel %vm295_vm0, %v305_v28, 0.0  ;;  %v3399_v35 = vpop.eup %3398  ;;  %3095 = vmatprep.mubr.msk.f32.mxu0 %vm444_vm8, %v4043_v40  ;;  %v190_v45 = vmul.f32 1.442695, %v2780_v37  ;;  %v2813_v36 = vclamps-f32 %v225_v38, 44.0  ;;  %3121 = vmatprep.mubr.msk.f32.mxu1 %vm444_vm8, %v4043_v40  ;;  %v1070_v52 = vrot.slane %v3861_v30, %v1059_v56 }
  0x78   :  { %v337_v44 = vsel %vm294_vm2, %v3395_v20, %v321_v41  ;;  %v286_v46 = vmul.f32 1.442695, %v2812_v33  ;;  %v3401_v47 = vpop.eup %3400  ;;  %v306_v50 = vmul.f32 %v3399_v35, %v3397_v31  ;;  %v192_v51 = vmul.f32 1.442695, %v2781_v42 }
  0x79   :  { %v353_v49 = vsel %vm293_vm4, %v3393_v14, %v337_v44  ;;  %3412 = vpow2.f32 %v190_v45  ;;  %v288_v54 = vmul.f32 1.442695, %v2813_v36  ;;  %v1342_v55 = vrot.slane %v3871_v39, %v4029_v0 }
  0x7a   :  { %v4060_v53 = vsel %vm292_vm6, 1.0, %v353_v49  ;;  %v3403_v4 = vpop.eup %3402  ;;  %v322_v21 = vsel %vm295_vm0, %v306_v50, 0.0  ;;  %3414 = vpow2.f32 %v286_v46  ;;  %v1071_v56 = vsel %vm425_vm5, %v1070_v52, %v1066_v43 }
  0x7b   :  { %3096 = vmatmul.mubr.msk.f32.gmra.mxu0 %vm444_vm8, %v4060_v53  ;;  %3122 = vmatmul.mubr.msk.f32.gmra.mxu1 %vm444_vm8, %v4060_v53  ;;  %v1347_v57 = vrot.slane %v3863_v34, %v4029_v0  ;;  %v338_v58 = vsel %vm294_vm2, %v3399_v35, %v322_v21  ;;  %v307_v59 = vmul.f32 %v3403_v4, %v3401_v47  ;;  %3416 = vpow2.f32 %v192_v51 }
  0x7c   :  { %v1072_v62 = vsel %vm424_vm7, 1.0, %v1071_v56  ;;  %v354_v3 = vsel %vm293_vm4, %v3397_v31, %v338_v58  ;;  %3418 = vpow2.f32 %v288_v54  ;;  %v1343_v6 = vsel %vm427_vm1, %v1342_v55, 0.0 }
  0x7d   :  { %3133 = vmatprep.subr.mxu0 %v1072_v62  ;;  %v1352_v7 = vrot.slane %v3861_v30, %v4029_v0  ;;  %v3405_v8 = vpop.eup %3404  ;;  %v4086_v9 = vsel %vm292_vm6, 1.0, %v354_v3  ;;  %v323_v12 = vsel %vm295_vm0, %v307_v59, 0.0  ;;  %v1348_v13 = vsel %vm426_vm3, %v1347_v57, %v1343_v6 }
  0x7e   :  { %3134 = vmatpush3.msra.mxu0 %v1072_v62  ;;  %v3407_v14 = vpop.eup %3406  ;;  %3098 = vmatprep.mubr.msk.f32.mxu0 %vm444_vm8, %v4086_v9  ;;  %v339_v15 = vsel %vm294_vm2, %v3403_v4, %v323_v12  ;;  %v1623_v16 = vsub.s32 4, %v3835_v2  ;;  %v1905_v18 = vsub.s32 5, %v3835_v2  ;;  %v2187_v21 = vsub.s32 6, %v3835_v2 }
  0x7f   :  { %3124 = vmatprep.mubr.msk.f32.mxu1 %vm444_vm8, %v4086_v9  ;;  %v1353_v0 = vsel %vm425_vm5, %v1352_v7, %v1348_v13  ;;  %v3409_v20 = vpop.eup %3408  ;;  %v355_v22 = vsel %vm293_vm4, %v3401_v47, %v339_v15  ;;  %v308_v23 = vmul.f32 %v3407_v14, %v3405_v8 }
  0x80   :  { %v1354_v24 = vsel %vm424_vm7, 1.0, %v1353_v0  ;;  %v4108_v25 = vsel %vm292_vm6, 1.0, %v355_v22  ;;  %v1624_v27 = vrot.slane %v3871_v39, %v1623_v16  ;;  %v1629_v28 = vrot.slane %v3863_v34, %v1623_v16 }
  0x81   :  { %3159 = vmatprep.subr.mxu1 %v1354_v24  ;;  %v1634_v29 = vrot.slane %v3861_v30, %v1623_v16  ;;  %v3411_v31 = vpop.eup %3410  ;;  %3099 = vmatmul.mubr.msk.f32.gmra.mxu0 %vm444_vm8, %v4108_v25  ;;  %v324_v32 = vsel %vm295_vm0, %v308_v23, 0.0  ;;  %v1906_v37 = vrot.slane %v3871_v39, %v1905_v18  ;;  %v1911_v33 = vrot.slane %v3863_v34, %v1905_v18 }
  0x82   :  { %3125 = vmatmul.mubr.msk.f32.gmra.mxu1 %vm444_vm8, %v4108_v25  ;;  %v1916_v38 = vrot.slane %v3861_v30, %v1905_v18  ;;  %v340_v41 = vsel %vm294_vm2, %v3407_v14, %v324_v32  ;;  %v309_v42 = vmul.f32 %v3411_v31, %v3409_v20  ;;  %v1625_v43 = vsel %vm427_vm1, %v1624_v27, 0.0 }
  0x83   :  { %3160 = vmatpush3.msra.mxu1 %v1354_v24  ;;  %v356_v35 = vsel %vm293_vm4, %v3405_v8, %v340_v41  ;;  %v1630_v44 = vsel %vm426_vm3, %v1629_v28, %v1625_v43  ;;  %v1907_v45 = vsel %vm427_vm1, %v1906_v37, 0.0  ;;  %v2188_v62 = vrot.slane %v3871_v39, %v2187_v21 }
  0x84   :  { %v4134_v46 = vsel %vm292_vm6, 1.0, %v356_v35  ;;  %v325_v36 = vsel %vm295_vm0, %v309_v42, 0.0  ;;  %v1635_v47 = vsel %vm425_vm5, %v1634_v29, %v1630_v44  ;;  %v1912_v49 = vsel %vm426_vm3, %v1911_v33, %v1907_v45 }
  0x85   :  { %3101 = vmatprep.mubr.msk.f32.mxu0 %vm444_vm8, %v4134_v46  ;;  %v341_v50 = vsel %vm294_vm2, %v3411_v31, %v325_v36  ;;  %3127 = vmatprep.mubr.msk.f32.mxu1 %vm444_vm8, %v4134_v46  ;;  %v1636_v51 = vsel %vm424_vm7, 1.0, %v1635_v47  ;;  %v1917_v52 = vsel %vm425_vm5, %v1916_v38, %v1912_v49  ;;  %v2193_v3 = vrot.slane %v3863_v34, %v2187_v21 }
  0x86   :  { %v3413_v54 = vpop.eup %3412  ;;  %v357_v55 = vsel %vm293_vm4, %v3409_v20, %v341_v50  ;;  %3185 = vmatprep.subr.mxu0 %v1636_v51  ;;  %v1918_v4 = vsel %vm424_vm7, 1.0, %v1917_v52  ;;  %v2198_v7 = vrot.slane %v3861_v30, %v2187_v21  ;;  %v2189_v13 = vsel %vm427_vm1, %v2188_v62, 0.0 }
  0x87   :  { %v3415_v56 = vpop.eup %3414  ;;  %v4159_v57 = vsel %vm292_vm6, 1.0, %v357_v55  ;;  %3211 = vmatprep.subr.mxu1 %v1918_v4  ;;  %v2194_v15 = vsel %vm426_vm3, %v2193_v3, %v2189_v13  ;;  %v2469_v27 = vsub.s32 7, %v3835_v2  ;;  %v3790_v33 = vmov 2  }
  0x88   :  { %v3417_v58 = vpop.eup %3416  ;;  %3102 = vmatmul.mubr.msk.f32.gmra.mxu0 %vm444_vm8, %v4159_v57  ;;  %v310_v59 = vmul.f32 %v3415_v56, %v3413_v54  ;;  %3128 = vmatmul.mubr.msk.f32.gmra.mxu1 %vm444_vm8, %v4159_v57  ;;  %v2199_v18 = vsel %vm425_vm5, %v2198_v7, %v2194_v15  ;;  %v5005_v55 = vmov 6  }
  0x89   :  { %v3419_v6 = vpop.eup %3418  ;;  %v2200_v23 = vsel %vm424_vm7, 1.0, %v2199_v18  ;;  %v2470_v29 = vrot.slane %v3871_v39, %v2469_v27  ;;  %v2475_v31 = vrot.slane %v3863_v34, %v2469_v27  ;;  %v2480_v32 = vrot.slane %v3861_v30, %v2469_v27 }
  0x8a   :  { %v326_v8 = vsel %vm295_vm0, %v310_v59, 0.0  ;;  %v311_v12 = vmul.f32 %v3419_v6, %v3417_v58  ;;  %v5004_v59 = vmov 7  }
  0x8b   :  { %v342_v14 = vsel %vm294_vm2, %v3415_v56, %v326_v8  ;;  %v2471_v5 = vsel %vm427_vm1, %v2470_v29, 0.0 }
  0x8c   :  { %v358_v0 = vsel %vm293_vm4, %v3413_v54, %v342_v14  ;;  %v327_v16 = vsel %vm295_vm0, %v311_v12, 0.0  ;;  %v2476_v37 = vsel %vm426_vm3, %v2475_v31, %v2471_v5 }
  0x8d   :  { %v4184_v20 = vsel %vm292_vm6, 1.0, %v358_v0  ;;  %v343_v22 = vsel %vm294_vm2, %v3419_v6, %v327_v16  ;;  %v2481_v30 = vsel %vm425_vm5, %v2480_v32, %v2476_v37 }
  0x8e   :  { %3104 = vmatprep.mubr.msk.f32.mxu0 %vm444_vm8, %v4184_v20  ;;  %v359_v24 = vsel %vm293_vm4, %v3417_v58, %v343_v22  ;;  %3130 = vmatprep.mubr.msk.f32.mxu1 %vm444_vm8, %v4184_v20  ;;  %v2482_v34 = vsel %vm424_vm7, 1.0, %v2481_v30 }
  0x8f   :  { %v4199_v28 = vsel %vm292_vm6, 1.0, %v359_v24 }
  0x90   :  { %3105 = vmatmul.mubr.msk.f32.gmra.mxu0 %vm444_vm8, %v4199_v28  ;;  %3131 = vmatmul.mubr.msk.f32.gmra.mxu1 %vm444_vm8, %v4199_v28 }
  0x91   :  { %3135 = vmatprep.mubr.msk.f32.mxu0 %vm444_vm8, %v3900_v63  ;;  %3161 = vmatprep.mubr.msk.f32.mxu1 %vm444_vm8, %v3900_v63 }
  0x94   :  { %3136 = vmatmul.mubr.msk.f32.vlgmr.msra.gmra.mxu0 %vm444_vm8, %v3918_v10  ;;  %3162 = vmatmul.mubr.msk.f32.vlgmr.msra.gmra.mxu1 %vm444_vm8, %v3918_v10 }
  0x95   :  { %3138 = vmatprep.mubr.msk.f32.mxu0 %vm444_vm8, %v3934_v17  ;;  %3164 = vmatprep.mubr.msk.f32.mxu1 %vm444_vm8, %v3934_v17 }
  0x96   :  { %3186 = vmatpush3.msra.mxu0 %v1636_v51  ;;  %3212 = vmatpush3.msra.mxu1 %v1918_v4 }
  0x97   :  { %3237 = vmatprep.subr.mxu0 %v2200_v23  ;;  %3263 = vmatprep.subr.mxu1 %v2482_v34 }
  0x98   :  { %3139 = vmatmul.mubr.msk.f32.gmra.mxu0 %vm444_vm8, %v3949_v26  ;;  %3165 = vmatmul.mubr.msk.f32.gmra.mxu1 %vm444_vm8, %v3949_v26 }
  0x99   :  { %3141 = vmatprep.mubr.msk.f32.mxu0 %vm444_vm8, %v3977_v61  ;;  %3167 = vmatprep.mubr.msk.f32.mxu1 %vm444_vm8, %v3977_v61 }
  0x9c   :  { %3142 = vmatmul.mubr.msk.f32.gmra.mxu0 %vm444_vm8, %v3991_v11  ;;  %3168 = vmatmul.mubr.msk.f32.gmra.mxu1 %vm444_vm8, %v3991_v11 }
  0x9d   :  { %3144 = vmatprep.mubr.msk.f32.mxu0 %vm444_vm8, %v4003_v19  ;;  %3170 = vmatprep.mubr.msk.f32.mxu1 %vm444_vm8, %v4003_v19 }
  0xa0   :  { %3145 = vmatmul.mubr.msk.f32.gmra.mxu0 %vm444_vm8, %v4019_v48  ;;  %3171 = vmatmul.mubr.msk.f32.gmra.mxu1 %vm444_vm8, %v4019_v48 }
  0xa1   :  { %3147 = vmatprep.mubr.msk.f32.mxu0 %vm444_vm8, %v4043_v40  ;;  %3173 = vmatprep.mubr.msk.f32.mxu1 %vm444_vm8, %v4043_v40 }
  0xa4   :  { %3148 = vmatmul.mubr.msk.f32.gmra.mxu0 %vm444_vm8, %v4060_v53  ;;  %3174 = vmatmul.mubr.msk.f32.gmra.mxu1 %vm444_vm8, %v4060_v53 }
  0xa5   :  { %3150 = vmatprep.mubr.msk.f32.mxu0 %vm444_vm8, %v4086_v9  ;;  %3176 = vmatprep.mubr.msk.f32.mxu1 %vm444_vm8, %v4086_v9 }
  0xa8   :  { %3151 = vmatmul.mubr.msk.f32.gmra.mxu0 %vm444_vm8, %v4108_v25  ;;  %3177 = vmatmul.mubr.msk.f32.gmra.mxu1 %vm444_vm8, %v4108_v25 }
  0xa9   :  { %3153 = vmatprep.mubr.msk.f32.mxu0 %vm444_vm8, %v4134_v46  ;;  %3179 = vmatprep.mubr.msk.f32.mxu1 %vm444_vm8, %v4134_v46 }
  0xac   :  { %3154 = vmatmul.mubr.msk.f32.gmra.mxu0 %vm444_vm8, %v4159_v57  ;;  %3180 = vmatmul.mubr.msk.f32.gmra.mxu1 %vm444_vm8, %v4159_v57 }
  0xad   :  { %3156 = vmatprep.mubr.msk.f32.mxu0 %vm444_vm8, %v4184_v20  ;;  %3182 = vmatprep.mubr.msk.f32.mxu1 %vm444_vm8, %v4184_v20  ;;  %v4284_v2 = vpop.trf.xlu0 }
  0xae   :  { %5024 = vst [vmem:[#allocation15_spill] sm:$0xff] %v4284_v2  ;;  %953 = vperm.xlu1 %3304, %v4284_v2   ;;  %656 = vperm.xlu0 %3303, %v4284_v2  }
  0xb0   :  { %3157 = vmatmul.mubr.msk.f32.gmra.mxu0 %vm444_vm8, %v4199_v28  ;;  %3183 = vmatmul.mubr.msk.f32.gmra.mxu1 %vm444_vm8, %v4199_v28 }
  0xb1   :  { %3187 = vmatprep.mubr.msk.f32.mxu0 %vm444_vm8, %v3900_v63  ;;  %3213 = vmatprep.mubr.msk.f32.mxu1 %vm444_vm8, %v3900_v63  ;;  %v4296_v39 = vpop.trf.xlu0 }
  0xb2   :  { %3305 = vset.pattern.permute.xlu1 %v3790_v33  ;;  %3308 = vset.pattern.permute.xlu0 %v3790_v33 }
  0xb3   :  { %1235 = vperm.xlu1 %3305, %v4284_v2   ;;  %1239 = vperm.xlu0 %3308, %v4296_v39  }
  0xb4   :  { %3188 = vmatmul.mubr.msk.f32.vlgmr.msra.gmra.mxu0 %vm444_vm8, %v3918_v10  ;;  %3214 = vmatmul.mubr.msk.f32.vlgmr.msra.gmra.mxu1 %vm444_vm8, %v3918_v10 }
  0xb5   :  { %3190 = vmatprep.mubr.msk.f32.mxu0 %vm444_vm8, %v3934_v17  ;;  %3216 = vmatprep.mubr.msk.f32.mxu1 %vm444_vm8, %v3934_v17  ;;  %v4306_v38 = vpop.trf.xlu0 }
  0xb6   :  { %3238 = vmatpush3.msra.mxu0 %v2200_v23  ;;  %3264 = vmatpush3.msra.mxu1 %v2482_v34 }
  0xb7   :  { %3306 = vset.pattern.permute.xlu1 %v3789_v60 }
  0xb8   :  { %3191 = vmatmul.mubr.msk.f32.gmra.mxu0 %vm444_vm8, %v3949_v26  ;;  %3217 = vmatmul.mubr.msk.f32.gmra.mxu1 %vm444_vm8, %v3949_v26 }
  0xb9   :  { %3193 = vmatprep.mubr.msk.f32.mxu0 %vm444_vm8, %v3977_v61  ;;  %3219 = vmatprep.mubr.msk.f32.mxu1 %vm444_vm8, %v3977_v61  ;;  %v4316_v41 = vpop.trf.xlu0 }
  0xba   :  { %661 = vperm.xlu1 %3306, %v4296_v39   ;;  %5025 = vst [vmem:[#allocation16_spill] sm:$0xff] %v4316_v41 }
  0xbc   :  { %3194 = vmatmul.mubr.msk.f32.gmra.mxu0 %vm444_vm8, %v3991_v11  ;;  %3220 = vmatmul.mubr.msk.f32.gmra.mxu1 %vm444_vm8, %v3991_v11 }
  0xbd   :  { %3196 = vmatprep.mubr.msk.f32.mxu0 %vm444_vm8, %v4003_v19  ;;  %3222 = vmatprep.mubr.msk.f32.mxu1 %vm444_vm8, %v4003_v19  ;;  %v4328_v42 = vpop.trf.xlu0 }
  0xbe   :  { %3307 = vset.pattern.permute.xlu1 %v3788_v1  ;;  %1251 = vperm.xlu0 %3308, %v4328_v42  }
  0xbf   :  { %957 = vperm.xlu1 %3307, %v4296_v39  }
  0xc0   :  { %3197 = vmatmul.mubr.msk.f32.gmra.mxu0 %vm444_vm8, %v4019_v48  ;;  %3223 = vmatmul.mubr.msk.f32.gmra.mxu1 %vm444_vm8, %v4019_v48 }
  0xc1   :  { %3199 = vmatprep.mubr.msk.f32.mxu0 %vm444_vm8, %v4043_v40  ;;  %3225 = vmatprep.mubr.msk.f32.mxu1 %vm444_vm8, %v4043_v40  ;;  %v4340_v43 = vpop.trf.xlu0 }
  0xc2   :  { %5026 = vst [vmem:[#allocation17_spill] sm:$0xff] %v4340_v43 }
  0xc3   :  { %3309 = vset.pattern.permute.xlu1 %v3789_v60 }
  0xc4   :  { %3200 = vmatmul.mubr.msk.f32.gmra.mxu0 %vm444_vm8, %v4060_v53  ;;  %666 = vperm.xlu1 %3309, %v4306_v38  }
  0xc5   :  { %3202 = vmatprep.mubr.msk.f32.mxu0 %vm444_vm8, %v4086_v9  ;;  %3226 = vmatmul.mubr.msk.f32.gmra.mxu1 %vm444_vm8, %v4060_v53  ;;  %v4351_v35 = vpop.trf.xlu0 }
  0xc6   :  { %3228 = vmatprep.mubr.msk.f32.mxu1 %vm444_vm8, %v4086_v9  ;;  %1259 = vperm.xlu0 %3308, %v4351_v35  }
  0xc8   :  { %3203 = vmatmul.mubr.msk.f32.gmra.mxu0 %vm444_vm8, %v4108_v25  ;;  %3310 = vset.pattern.permute.xlu1 %v3788_v1 }
  0xc9   :  { %3205 = vmatprep.mubr.msk.f32.mxu0 %vm444_vm8, %v4134_v46  ;;  %961 = vperm.xlu1 %3310, %v4306_v38   ;;  %v4364_v44 = vpop.trf.xlu0 }
  0xca   :  { %3229 = vmatmul.mubr.msk.f32.gmra.mxu1 %vm444_vm8, %v4108_v25  ;;  %5027 = vst [vmem:[#allocation18_spill] sm:$0xff] %v4364_v44 }
  0xcb   :  { %3231 = vmatprep.mubr.msk.f32.mxu1 %vm444_vm8, %v4134_v46 }
  0xcc   :  { %3206 = vmatmul.mubr.msk.f32.gmra.mxu0 %vm444_vm8, %v4159_v57 }
  0xcd   :  { %3208 = vmatprep.mubr.msk.f32.mxu0 %vm444_vm8, %v4184_v20  ;;  %3311 = vset.pattern.permute.xlu1 %v3790_v33  ;;  %v4374_v45 = vpop.trf.xlu0 }
  0xce   :  { %3232 = vmatmul.mubr.msk.f32.gmra.mxu1 %vm444_vm8, %v4159_v57  ;;  %1243 = vperm.xlu1 %3311, %v4306_v38  }
  0xcf   :  { %3234 = vmatprep.mubr.msk.f32.mxu1 %vm444_vm8, %v4184_v20  ;;  %1267 = vperm.xlu0 %3308, %v4374_v45  }
  0xd0   :  { %3209 = vmatmul.mubr.msk.f32.gmra.mxu0 %vm444_vm8, %v4199_v28 }
  0xd1   :  { %3239 = vmatprep.mubr.msk.f32.mxu0 %vm444_vm8, %v3900_v63  ;;  %v4387_v36 = vpop.trf.xlu0 }
  0xd2   :  { %3235 = vmatmul.mubr.msk.f32.gmra.mxu1 %vm444_vm8, %v4199_v28  ;;  %3312 = vset.pattern.permute.xlu1 %v3789_v60  ;;  %5028 = vst [vmem:[#allocation19_spill] sm:$0xff] %v4387_v36 }
  0xd3   :  { %671 = vperm.xlu1 %3312, %v4316_v41   ;;  %3334 = vset.pattern.permute.xlu0 %v3788_v1 }
  0xd4   :  { %3240 = vmatmul.mubr.msk.f32.vlgmr.msra.gmra.mxu0 %vm444_vm8, %v3918_v10  ;;  %3265 = vmatprep.mubr.msk.f32.mxu1 %vm444_vm8, %v3900_v63 }
  0xd5   :  { %3242 = vmatprep.mubr.msk.f32.mxu0 %vm444_vm8, %v3934_v17  ;;  %v4401_v47 = vpop.trf.xlu0 }
  0xd6   :  { %3266 = vmatmul.mubr.msk.f32.vlgmr.msra.gmra.mxu1 %vm444_vm8, %v3918_v10  ;;  %5029 = vst [vmem:[#allocation20_spill] sm:$0xff] %v4401_v47 }
  0xd7   :  { %3268 = vmatprep.mubr.msk.f32.mxu1 %vm444_vm8, %v3934_v17  ;;  %3313 = vset.pattern.permute.xlu1 %v3788_v1 }
  0xd8   :  { %3243 = vmatmul.mubr.msk.f32.gmra.mxu0 %vm444_vm8, %v3949_v26  ;;  %965 = vperm.xlu1 %3313, %v4316_v41  }
  0xd9   :  { %3245 = vmatprep.mubr.msk.f32.mxu0 %vm444_vm8, %v3977_v61  ;;  %v4412_v63 = vpop.trf.xlu0 }
  0xda   :  { %3269 = vmatmul.mubr.msk.f32.gmra.mxu1 %vm444_vm8, %v3949_v26  ;;  %5030 = vst [vmem:[#allocation21_spill] sm:$0xff] %v4412_v63 }
  0xdb   :  { %3271 = vmatprep.mubr.msk.f32.mxu1 %vm444_vm8, %v3977_v61 }
  0xdc   :  { %3246 = vmatmul.mubr.msk.f32.gmra.mxu0 %vm444_vm8, %v3991_v11  ;;  %3314 = vset.pattern.permute.xlu1 %v3790_v33 }
  0xdd   :  { %3248 = vmatprep.mubr.msk.f32.mxu0 %vm444_vm8, %v4003_v19  ;;  %1247 = vperm.xlu1 %3314, %v4316_v41   ;;  %v4424_v10 = vpop.trf.xlu0 }
  0xde   :  { %3272 = vmatmul.mubr.msk.f32.gmra.mxu1 %vm444_vm8, %v3991_v11  ;;  %5031 = vst [vmem:[#allocation22_spill] sm:$0xff] %v4424_v10  ;;  %1001 = vperm.xlu0 %3334, %v4424_v10   ;;  %v3791_v11 = vmov 3  }
  0xdf   :  { %3274 = vmatprep.mubr.msk.f32.mxu1 %vm444_vm8, %v4003_v19  ;;  %v3792_v19 = vmov 4  }
  0xe0   :  { %3249 = vmatmul.mubr.msk.f32.gmra.mxu0 %vm444_vm8, %v4019_v48 }
  0xe1   :  { %3251 = vmatprep.mubr.msk.f32.mxu0 %vm444_vm8, %v4043_v40  ;;  %3315 = vset.pattern.permute.xlu1 %v3789_v60  ;;  %v4435_v17 = vpop.trf.xlu0 }
  0xe2   :  { %3275 = vmatmul.mubr.msk.f32.gmra.mxu1 %vm444_vm8, %v4019_v48  ;;  %676 = vperm.xlu1 %3315, %v4328_v42   ;;  %5032 = vst [vmem:[#allocation23_spill] sm:$0xff] %v4435_v17 }
  0xe3   :  { %3277 = vmatprep.mubr.msk.f32.mxu1 %vm444_vm8, %v4043_v40 }
  0xe4   :  { %3252 = vmatmul.mubr.msk.f32.gmra.mxu0 %vm444_vm8, %v4060_v53 }
  0xe5   :  { %3254 = vmatprep.mubr.msk.f32.mxu0 %vm444_vm8, %v4086_v9  ;;  %v4447_v26 = vpop.trf.xlu0 }
  0xe6   :  { %3278 = vmatmul.mubr.msk.f32.gmra.mxu1 %vm444_vm8, %v4060_v53  ;;  %3316 = vset.pattern.permute.xlu1 %v3788_v1  ;;  %5033 = vst [vmem:[#allocation24_spill] sm:$0xff] %v4447_v26 }
  0xe7   :  { %3280 = vmatprep.mubr.msk.f32.mxu1 %vm444_vm8, %v4086_v9  ;;  %969 = vperm.xlu1 %3316, %v4328_v42  }
  0xe8   :  { %3255 = vmatmul.mubr.msk.f32.gmra.mxu0 %vm444_vm8, %v4108_v25 }
  0xe9   :  { %3257 = vmatprep.mubr.msk.f32.mxu0 %vm444_vm8, %v4134_v46  ;;  %v4458_v61 = vpop.trf.xlu0 }
  0xea   :  { %3281 = vmatmul.mubr.msk.f32.gmra.mxu1 %vm444_vm8, %v4108_v25  ;;  %5034 = vst [vmem:[#allocation25_spill] sm:$0xff] %v4458_v61  ;;  %1013 = vperm.xlu0 %3334, %v4458_v61   ;;  %v5007_v25 = vmov 5  }
  0xeb   :  { %3283 = vmatprep.mubr.msk.f32.mxu1 %vm444_vm8, %v4134_v46  ;;  %3317 = vset.pattern.permute.xlu1 %v3789_v60 }
  0xec   :  { %3258 = vmatmul.mubr.msk.f32.gmra.mxu0 %vm444_vm8, %v4159_v57  ;;  %681 = vperm.xlu1 %3317, %v4340_v43  }
  0xed   :  { %3260 = vmatprep.mubr.msk.f32.mxu0 %vm444_vm8, %v4184_v20 }
  0xee   :  { %3284 = vmatmul.mubr.msk.f32.gmra.mxu1 %vm444_vm8, %v4159_v57  ;;  %3340 = vset.pattern.permute.xlu0 %v3790_v33 }
  0xef   :  { %3286 = vmatprep.mubr.msk.f32.mxu1 %vm444_vm8, %v4184_v20  ;;  %1275 = vperm.xlu0 %3340, %v4401_v47  }
  0xf0   :  { %3261 = vmatmul.mubr.msk.f32.gmra.mxu0 %vm444_vm8, %v4199_v28  ;;  %3318 = vset.pattern.permute.xlu1 %v3788_v1 }
  0xf1   :  { %973 = vperm.xlu1 %3318, %v4340_v43  }
  0xf2   :  { %3287 = vmatmul.mubr.msk.f32.gmra.mxu1 %vm444_vm8, %v4199_v28 }
  0xf3   :  { %1283 = vperm.xlu0 %3340, %v4424_v10  }
  0xf5   :  { %3319 = vset.pattern.permute.xlu1 %v3790_v33 }
  0xf6   :  { %1255 = vperm.xlu1 %3319, %v4340_v43  }
  0xf7   :  { %1291 = vperm.xlu0 %3340, %v4447_v26  }
  0xfa   :  { %3320 = vset.pattern.permute.xlu1 %v3789_v60 }
  0xfb   :  { %686 = vperm.xlu1 %3320, %v4351_v35   ;;  %3341 = vset.pattern.permute.xlu0 %v3791_v11 }
  0xfc   :  { %1517 = vperm.xlu0 %3341, %v4284_v2  }
  0xff   :  { %3321 = vset.pattern.permute.xlu1 %v3788_v1 }
 0x100   :  { %977 = vperm.xlu1 %3321, %v4351_v35   ;;  %1529 = vperm.xlu0 %3341, %v4316_v41  }
 0x104   :  { %3322 = vset.pattern.permute.xlu1 %v3789_v60  ;;  %1537 = vperm.xlu0 %3341, %v4340_v43  }
 0x105   :  { %691 = vperm.xlu1 %3322, %v4364_v44  }
 0x108   :  { %1545 = vperm.xlu0 %3341, %v4364_v44  }
 0x109   :  { %3323 = vset.pattern.permute.xlu1 %v3788_v1 }
 0x10a   :  { %981 = vperm.xlu1 %3323, %v4364_v44  }
 0x10c   :  { %1553 = vperm.xlu0 %3341, %v4387_v36  }
 0x10e   :  { %3324 = vset.pattern.permute.xlu1 %v3790_v33 }
 0x10f   :  { %1263 = vperm.xlu1 %3324, %v4364_v44  }
 0x110   :  { %1561 = vperm.xlu0 %3341, %v4412_v63  }
 0x113   :  { %3325 = vset.pattern.permute.xlu1 %v3789_v60 }
 0x114   :  { %696 = vperm.xlu1 %3325, %v4374_v45   ;;  %1569 = vperm.xlu0 %3341, %v4435_v17  }
 0x118   :  { %3326 = vset.pattern.permute.xlu1 %v3788_v1  ;;  %1577 = vperm.xlu0 %3341, %v4458_v61  }
 0x119   :  { %985 = vperm.xlu1 %3326, %v4374_v45  }
 0x11a   :  { %v3111_v24 = vpop.f32.mrf.mxu1 }
 0x11c   :  { %3344 = vset.pattern.permute.xlu0 %v3792_v19  ;;  %v857_v28 = vpop.f32.mrf.mxu1 }
 0x11d   :  { %3327 = vset.pattern.permute.xlu1 %v3789_v60  ;;  %1803 = vperm.xlu0 %3344, %v4296_v39  }
 0x11e   :  { %701 = vperm.xlu1 %3327, %v4387_v36   ;;  %v3114_v5 = vpop.f32.mrf.mxu1 }
 0x120   :  { %v867_v34 = vpop.f32.mrf.mxu1 }
 0x121   :  { %1815 = vperm.xlu0 %3344, %v4328_v42  }
 0x122   :  { %3328 = vset.pattern.permute.xlu1 %v3788_v1 }
 0x123   :  { %989 = vperm.xlu1 %3328, %v4387_v36  }
 0x125   :  { %1823 = vperm.xlu0 %3344, %v4351_v35  }
 0x127   :  { %3329 = vset.pattern.permute.xlu1 %v3789_v60 }
 0x128   :  { %706 = vperm.xlu1 %3329, %v4401_v47  }
 0x129   :  { %v4515_v48 = vpop.permute.xlu1 %953  ;;  %1831 = vperm.xlu0 %3344, %v4374_v45   ;;  %v4576_v21 = vpop.permute.xlu0 %656 }
 0x12c   :  { %3330 = vset.pattern.permute.xlu1 %v3788_v1 }
 0x12d   :  { %993 = vperm.xlu1 %3330, %v4401_v47   ;;  %1839 = vperm.xlu0 %3344, %v4401_v47  }
 0x12e   :  { %v4521_v40 = vpop.permute.xlu1 %1235  ;;  %v4584_v58 = vpop.permute.xlu0 %1239 }
 0x131   :  { %3331 = vset.pattern.permute.xlu1 %v3789_v60  ;;  %1847 = vperm.xlu0 %3344, %v4424_v10  }
 0x132   :  { %711 = vperm.xlu1 %3331, %v4412_v63  }
 0x135   :  { %v4526_v53 = vpop.permute.xlu1 %661  ;;  %1855 = vperm.xlu0 %3344, %v4447_v26  }
 0x136   :  { %3332 = vset.pattern.permute.xlu1 %v3788_v1 }
 0x137   :  { %997 = vperm.xlu1 %3332, %v4412_v63  }
 0x139   :  { %3345 = vset.pattern.permute.xlu0 %v5007_v25  ;;  %v4593_v6 = vpop.permute.xlu0 %1251 }
 0x13a   :  { %v4531_v9 = vpop.permute.xlu1 %957  ;;  %2081 = vperm.xlu0 %3345, %v4284_v2   ;;  %5035 = vst [vmem:[#allocation26_spill] sm:$0xff] %v4593_v6 }
 0x13b   :  { %3333 = vset.pattern.permute.xlu1 %v3789_v60 }
 0x13c   :  { %716 = vperm.xlu1 %3333, %v4424_v10  }
 0x13e   :  { %2093 = vperm.xlu0 %3345, %v4316_v41  }
 0x13f   :  { %v4537_v46 = vpop.permute.xlu1 %666 }
 0x140   :  { %721 = vperm.xlu1 %3333, %v4435_v17  }
 0x141   :  { %v4606_v13 = vpop.permute.xlu0 %1259 }
 0x142   :  { %2101 = vperm.xlu0 %3345, %v4340_v43   ;;  %5036 = vst [vmem:[#allocation27_spill] sm:$0xff] %v4606_v13 }
 0x144   :  { %v4541_v49 = vpop.permute.xlu1 %961  ;;  %3335 = vset.pattern.permute.xlu1 %v3788_v1 }
 0x145   :  { %1005 = vperm.xlu1 %3335, %v4435_v17  }
 0x146   :  { %2109 = vperm.xlu0 %3345, %v4364_v44  }
 0x149   :  { %v4547_v50 = vpop.permute.xlu1 %1243  ;;  %3336 = vset.pattern.permute.xlu1 %v3789_v60 }
 0x14a   :  { %726 = vperm.xlu1 %3336, %v4447_v26   ;;  %2117 = vperm.xlu0 %3345, %v4387_v36   ;;  %v4614_v0 = vpop.permute.xlu0 %1267 }
 0x14b   :  { %5038 = vst [vmem:[#allocation29_spill] sm:$0xff] %v4614_v0 }
 0x14e   :  { %v4552_v51 = vpop.permute.xlu1 %671  ;;  %3337 = vset.pattern.permute.xlu1 %v3788_v1  ;;  %2125 = vperm.xlu0 %3345, %v4412_v63   ;;  %v4567_v1 = vpop.f32.mrf.mxu0 }
 0x14f   :  { %1009 = vperm.xlu1 %3337, %v4447_v26   ;;  %3420 = vrcp.f32 %v4567_v1 }
 0x152   :  { %2133 = vperm.xlu0 %3345, %v4435_v17  }
 0x153   :  { %v4557_v52 = vpop.permute.xlu1 %965  ;;  %3338 = vset.pattern.permute.xlu1 %v3789_v60  ;;  %v4574_v60 = vpop.f32.mrf.mxu0 }
 0x154   :  { %731 = vperm.xlu1 %3338, %v4458_v61   ;;  %3422 = vrcp.f32 %v4574_v60 }
 0x155   :  { %v4580_v56 = vpop.f32.mrf.mxu0  ;;  %3424 = vrcp.f32 %v3111_v24 }
 0x156   :  { %2141 = vperm.xlu0 %3345, %v4458_v61   ;;  %3426 = vrcp.f32 %v4580_v56 }
 0x157   :  { %v4588_v62 = vpop.f32.mrf.mxu0  ;;  %3428 = vrcp.f32 %v857_v28 }
 0x158   :  { %v4562_v54 = vpop.permute.xlu1 %1247  ;;  %3339 = vset.pattern.permute.xlu1 %v3790_v33  ;;  %3430 = vrcp.f32 %v4588_v62 }
 0x159   :  { %1271 = vperm.xlu1 %3339, %v4387_v36   ;;  %v4596_v7 = vpop.f32.mrf.mxu0  ;;  %v4626_v22 = vpop.permute.xlu0 %1001  ;;  %3432 = vrcp.f32 %v3114_v5 }
 0x15a   :  { %3348 = vset.pattern.permute.xlu0 %v5005_v55  ;;  %5039 = vst [vmem:[#allocation30_spill] sm:$0xff] %v4626_v22  ;;  %3434 = vrcp.f32 %v867_v34 }
 0x15b   :  { %2367 = vperm.xlu0 %3348, %v4296_v39   ;;  %v4602_v12 = vpop.f32.mrf.mxu0  ;;  %3436 = vrcp.f32 %v4596_v7 }
 0x15c   :  { %v3421_v28 = vpop.eup %3420 }
 0x15d   :  { %v4570_v4 = vpop.permute.xlu1 %676  ;;  %1279 = vperm.xlu1 %3339, %v4412_v63   ;;  %v4610_v15 = vpop.f32.mrf.mxu0 }
 0x15f   :  { %2379 = vperm.xlu0 %3348, %v4328_v42   ;;  %v4616_v16 = vpop.f32.mrf.mxu0 }
 0x161   :  { %1287 = vperm.xlu1 %3339, %v4435_v17   ;;  %v4622_v20 = vpop.f32.mrf.mxu0  ;;  %v3423_v7 = vpop.eup %3422 }
 0x162   :  { %v4582_v57 = vpop.permute.xlu1 %969 }
 0x163   :  { %3350 = vset.pattern.permute.xlu0 %v5004_v59  ;;  %v4630_v27 = vpop.f32.mrf.mxu0 }
 0x164   :  { %2649 = vperm.xlu0 %3350, %v4296_v39  }
 0x165   :  { %1295 = vperm.xlu1 %3339, %v4458_v61   ;;  %v4636_v31 = vpop.permute.xlu0 %1013  ;;  %v4638_v32 = vpop.f32.mrf.mxu0 }
 0x166   :  { %5040 = vst [vmem:[#allocation31_spill] sm:$0xff] %v4636_v31 }
 0x167   :  { %v4591_v3 = vpop.permute.xlu1 %681  ;;  %v4644_v30 = vpop.f32.mrf.mxu0 }
 0x168   :  { %2661 = vperm.xlu0 %3350, %v4328_v42  }
 0x169   :  { %3342 = vset.pattern.permute.xlu1 %v3791_v11  ;;  %v3117_v11 = vpop.f32.mrf.mxu1  ;;  %v4650_v59 = vpop.f32.mrf.mxu0 }
 0x16a   :  { %1521 = vperm.xlu1 %3342, %v4296_v39   ;;  %v4648_v33 = vpop.permute.xlu0 %1275  ;;  %3438 = vrcp.f32 %v3117_v11  ;;  %v3425_v11 = vpop.eup %3424 }
 0x16b   :  { %5041 = vst [vmem:[#allocation32_spill] sm:$0xff] %v4648_v33  ;;  %v877_v25 = vpop.f32.mrf.mxu1  ;;  %v4659_v13 = vpop.f32.mrf.mxu0  ;;  %3440 = vrcp.f32 %v4602_v12 }
 0x16c   :  { %v4600_v8 = vpop.permute.xlu1 %973  ;;  %2665 = vperm.xlu0 %3350, %v4340_v43   ;;  %3442 = vrcp.f32 %v877_v25  ;;  %v3427_v25 = vpop.eup %3426 }
 0x16d   :  { %v3120_v33 = vpop.f32.mrf.mxu1  ;;  %3444 = vrcp.f32 %v4610_v15  ;;  %v3429_v12 = vpop.eup %3428 }
 0x16e   :  { %1525 = vperm.xlu1 %3342, %v4306_v38   ;;  %v4657_v0 = vpop.permute.xlu0 %1283  ;;  %3446 = vrcp.f32 %v3120_v33  ;;  %v3431_v33 = vpop.eup %3430 }
 0x16f   :  { %5043 = vst [vmem:[#allocation34_spill] sm:$0xff] %v4657_v0  ;;  %3448 = vrcp.f32 %v4616_v16 }
 0x170   :  { %2669 = vperm.xlu0 %3350, %v4351_v35  }
 0x171   :  { %v4608_v14 = vpop.permute.xlu1 %1255 }
 0x172   :  { %5037 = vst [vmem:[#allocation28_spill] sm:$0xff] %v4608_v14  ;;  %1533 = vperm.xlu1 %3342, %v4328_v42   ;;  %v4665_v14 = vpop.f32.mrf.mxu0 }
 0x174   :  { %2673 = vperm.xlu0 %3350, %v4364_v44   ;;  %v4673_v0 = vpop.f32.mrf.mxu0 }
 0x176   :  { %v4618_v18 = vpop.permute.xlu1 %686  ;;  %1541 = vperm.xlu1 %3342, %v4351_v35  }
 0x178   :  { %2677 = vperm.xlu0 %3350, %v4374_v45  }
 0x17a   :  { %1549 = vperm.xlu1 %3342, %v4374_v45  }
 0x17b   :  { %v4628_v23 = vpop.permute.xlu1 %977 }
 0x17c   :  { %2681 = vperm.xlu0 %3350, %v4387_v36  }
 0x17e   :  { %1557 = vperm.xlu1 %3342, %v4401_v47  }
 0x180   :  { %v4634_v29 = vpop.permute.xlu1 %691  ;;  %2685 = vperm.xlu0 %3350, %v4401_v47  }
 0x182   :  { %1565 = vperm.xlu1 %3342, %v4424_v10  }
 0x184   :  { %2689 = vperm.xlu0 %3350, %v4412_v63  }
 0x185   :  { %v4642_v37 = vpop.permute.xlu1 %981 }
 0x186   :  { %1573 = vperm.xlu1 %3342, %v4447_v26  }
 0x188   :  { %2693 = vperm.xlu0 %3350, %v4424_v10  }
 0x18a   :  { %v4652_v55 = vpop.permute.xlu1 %1263  ;;  %3343 = vset.pattern.permute.xlu1 %v3792_v19  ;;  %v887_v19 = vpop.f32.mrf.mxu1 }
 0x18b   :  { %5042 = vst [vmem:[#allocation33_spill] sm:$0xff] %v4652_v55  ;;  %1799 = vperm.xlu1 %3343, %v4284_v2   ;;  %v4668_v55 = vpop.permute.xlu0 %1291  ;;  %3450 = vrcp.f32 %v887_v19 }
 0x18c   :  { %2697 = vperm.xlu0 %3350, %v4435_v17   ;;  %5044 = vst [vmem:[#allocation35_spill] sm:$0xff] %v4668_v55  ;;  %v3123_v10 = vpop.f32.mrf.mxu1  ;;  %3452 = vrcp.f32 %v4622_v20 }
 0x18d   :  { %3454 = vrcp.f32 %v3123_v10 }
 0x18e   :  { %v897_v1 = vpop.f32.mrf.mxu1  ;;  %3456 = vrcp.f32 %v4630_v27 }
 0x18f   :  { %v4662_v31 = vpop.permute.xlu1 %696  ;;  %1807 = vperm.xlu1 %3343, %v4306_v38   ;;  %3458 = vrcp.f32 %v897_v1 }
 0x190   :  { %2701 = vperm.xlu0 %3350, %v4447_v26   ;;  %v4679_v26 = vpop.permute.xlu0 %1517  ;;  %v3126_v56 = vpop.f32.mrf.mxu1  ;;  %3460 = vrcp.f32 %v4638_v32  ;;  %v1016_v32 = vmul.f32 %v3429_v12, %v4515_v48 }
 0x191   :  { %5045 = vst [vmem:[#allocation36_spill] sm:$0xff] %v4679_v26  ;;  %v1017_v26 = vmul.f32 %v3425_v11, %v4531_v9 }
 0x192   :  { %v907_v34 = vpop.f32.mrf.mxu1 }
 0x193   :  { %1811 = vperm.xlu1 %3343, %v4316_v41   ;;  %v3137_v41 = vpop.f32.mrf.mxu0 }
 0x194   :  { %v4671_v2 = vpop.permute.xlu1 %985  ;;  %2705 = vperm.xlu0 %3350, %v4458_v61   ;;  %v4689_v60 = vpop.permute.xlu0 %1529 }
 0x195   :  { %v1139_v6 = vpop.f32.mrf.mxu0  ;;  %5046 = vst [vmem:[#allocation37_spill] sm:$0xff] %v4689_v60  ;;  %v3129_v16 = vpop.f32.mrf.mxu1 }
 0x196   :  { %3462 = vrcp.f32 %v1139_v6 }
 0x197   :  { %1819 = vperm.xlu1 %3343, %v4340_v43   ;;  %v3140_v24 = vpop.f32.mrf.mxu0  ;;  %v917_v27 = vpop.f32.mrf.mxu1 }
 0x199   :  { %v4681_v55 = vpop.permute.xlu1 %701  ;;  %v1149_v5 = vpop.f32.mrf.mxu0 }
 0x19b   :  { %1827 = vperm.xlu1 %3343, %v4364_v44   ;;  %v4700_v44 = vpop.f32.mrf.mxu0 }
 0x19d   :  { %v1159_v60 = vpop.f32.mrf.mxu0 }
 0x19e   :  { %v4686_v43 = vpop.permute.xlu1 %989 }
 0x19f   :  { %1835 = vperm.xlu1 %3343, %v4387_v36   ;;  %v4698_v36 = vpop.permute.xlu0 %1537  ;;  %v4713_v10 = vpop.f32.mrf.mxu0 }
 0x1a0   :  { %5048 = vst [vmem:[#allocation39_spill] sm:$0xff] %v4698_v36 }
 0x1a1   :  { %v1169_v22 = vpop.f32.mrf.mxu0 }
 0x1a3   :  { %v4694_v62 = vpop.permute.xlu1 %706  ;;  %1843 = vperm.xlu1 %3343, %v4412_v63   ;;  %v3433_v63 = vpop.eup %3432  ;;  %3464 = vrcp.f32 %v907_v34  ;;  %v1032_v34 = vadd.f32 %v1017_v26, %v1016_v32 }
 0x1a4   :  { %5047 = vst [vmem:[#allocation38_spill] sm:$0xff] %v4694_v62  ;;  %v3435_v36 = vpop.eup %3434  ;;  %v4708_v19 = vpop.permute.xlu0 %1545  ;;  %3466 = vrcp.f32 %v3137_v41  ;;  %v1019_v11 = vmul.f32 %v3433_v63, %v4557_v52  ;;  %v734_v63 = vmul.f32 %v3423_v7, %v4576_v21  ;;  %v736_v52 = vmul.f32 %v3431_v33, %v4537_v46 }
 0x1a5   :  { %5049 = vst [vmem:[#allocation40_spill] sm:$0xff] %v4708_v19  ;;  %v4711_v20 = vpop.eup %3436  ;;  %3468 = vrcp.f32 %v1149_v5  ;;  %v5051_v19 = vmov 5   ;;  %v3132_v41 = vpop.f32.mrf.mxu1 }
 0x1a7   :  { %1851 = vperm.xlu1 %3343, %v4435_v17   ;;  %v3439_v17 = vpop.eup %3438  ;;  %3470 = vrcp.f32 %v3126_v56 }
 0x1a8   :  { %v4704_v15 = vpop.permute.xlu1 %993  ;;  %v3441_v1 = vpop.eup %3440  ;;  %3472 = vrcp.f32 %v3140_v24 }
 0x1a9   :  { %v3443_v62 = vpop.eup %3442  ;;  %3474 = vrcp.f32 %v4644_v30 }
 0x1aa   :  { %v4721_v6 = vpop.eup %3444  ;;  %3476 = vrcp.f32 %v4650_v59  ;;  %v1020_v26 = vmul.f32 %v3443_v62, %v4582_v57  ;;  %v927_v57 = vpop.f32.mrf.mxu1 }
 0x1ab   :  { %1859 = vperm.xlu1 %3343, %v4458_v61   ;;  %v1018_v61 = vmul.f32 %v3435_v36, %v4541_v49  ;;  %v3447_v9 = vpop.eup %3446  ;;  %v735_v36 = vmul.f32 %v3421_v28, %v4526_v53  ;;  %v4729_v49 = vpop.f32.mrf.mxu0  ;;  %3478 = vrcp.f32 %v917_v27  ;;  %v1021_v28 = vmul.f32 %v3439_v17, %v4600_v8 }
 0x1ac   :  { %v3449_v48 = vpop.eup %3448  ;;  %3480 = vrcp.f32 %v1159_v60  ;;  %v739_v27 = vmul.f32 %v4711_v20, %v4591_v3  ;;  %v4756_v32 = vpop.f32.mrf.mxu1 }
 0x1ad   :  { %v4716_v47 = vpop.permute.xlu1 %711  ;;  %v3451_v56 = vpop.eup %3450  ;;  %3482 = vrcp.f32 %v3129_v16  ;;  %v740_v3 = vmul.f32 %v3449_v48, %v4618_v18  ;;  %v741_v18 = vmul.f32 %v4721_v6, %v4634_v29 }
 0x1ae   :  { %5050 = vst [vmem:[#allocation41_spill] sm:$0xff] %v4716_v47  ;;  %v4725_v47 = vpop.permute.xlu0 %1553  ;;  %v4735_v24 = vpop.eup %3452  ;;  %3484 = vrcp.f32 %v4700_v44  ;;  %v1022_v46 = vmul.f32 %v3451_v56, %v4628_v23  ;;  %v1023_v44 = vmul.f32 %v3447_v9, %v4642_v37 }
 0x1af   :  { %3346 = vset.pattern.permute.xlu1 %v5051_v19  ;;  %v3455_v53 = vpop.eup %3454  ;;  %v750_v19 = vadd.f32 %v735_v36, %v734_v63  ;;  %v1179_v59 = vpop.f32.mrf.mxu0  ;;  %3486 = vrcp.f32 %v4659_v13 }
 0x1b0   :  { %2085 = vperm.xlu1 %3346, %v4296_v39   ;;  %v1033_v39 = vadd.f32 %v1032_v34, %v1018_v61  ;;  %v3457_v12 = vpop.eup %3456  ;;  %v737_v61 = vmul.f32 %v3427_v25, %v4552_v51  ;;  %v738_v51 = vmul.f32 %v3441_v1, %v4570_v4  ;;  %3488 = vrcp.f32 %v3132_v41 }
 0x1b1   :  { %v3459_v62 = vpop.eup %3458  ;;  %v751_v17 = vadd.f32 %v750_v19, %v736_v52  ;;  %3490 = vrcp.f32 %v927_v57  ;;  %v4758_v34 = vpop.f32.mrf.mxu0 }
 0x1b2   :  { %v4731_v5 = vpop.permute.xlu1 %997  ;;  %v1034_v30 = vadd.f32 %v1033_v39, %v1019_v11  ;;  %v4744_v7 = vpop.permute.xlu0 %1561 }
 0x1b3   :  { %v4748_v60 = vpop.eup %3460  ;;  %v752_v23 = vadd.f32 %v751_v17, %v737_v61  ;;  %3492 = vrcp.f32 %v1169_v22  ;;  %v5052_v17 = vld [vmem:[#allocation30_spill] sm:$0xff] }
 0x1b4   :  { %2089 = vperm.xlu1 %3346, %v4306_v38   ;;  %v1035_v21 = vadd.f32 %v1034_v30, %v1020_v26  ;;  %v3463_v8 = vpop.eup %3462  ;;  %3494 = vrcp.f32 %v4673_v0  ;;  %v4772_v0 = vpop.f32.mrf.mxu1  ;;  %v742_v30 = vmul.f32 %v3457_v12, %v4662_v31 }
 0x1b5   :  { %v3465_v16 = vpop.eup %3464  ;;  %v1298_v37 = vmul.f32 %v3463_v8, %v4521_v40  ;;  %v753_v9 = vadd.f32 %v752_v23, %v738_v51  ;;  %3496 = vrcp.f32 %v4713_v10  ;;  %v1189_v40 = vpop.f32.mrf.mxu0  ;;  %v5055_v23 = vld [vmem:[#allocation26_spill] sm:$0xff] }
 0x1b6   :  { %v1036_v25 = vadd.f32 %v1035_v21, %v1021_v28  ;;  %v3467_v13 = vpop.eup %3466  ;;  %v4768_v22 = vpop.permute.xlu0 %1569  ;;  %v1026_v10 = vmul.f32 %v3465_v16, %v4704_v15  ;;  %3498 = vrcp.f32 %v4665_v14  ;;  %v743_v14 = vmul.f32 %v4735_v24, %v4681_v55 }
 0x1b7   :  { %v4746_v33 = vpop.permute.xlu1 %716  ;;  %v3469_v11 = vpop.eup %3468  ;;  %v1299_v56 = vmul.f32 %v3467_v13, %v4584_v58  ;;  %v754_v39 = vadd.f32 %v753_v9, %v739_v27  ;;  %3500 = vrcp.f32 %v1179_v59  ;;  %v5053_v59 = vld [vmem:[#allocation38_spill] sm:$0xff] }
 0x1b8   :  { %2097 = vperm.xlu1 %3346, %v4328_v42   ;;  %v1037_v4 = vadd.f32 %v1036_v25, %v1022_v46  ;;  %v1024_v42 = vmul.f32 %v3459_v62, %v4671_v2  ;;  %v3471_v20 = vpop.eup %3470  ;;  %v1025_v2 = vmul.f32 %v3455_v53, %v4686_v43  ;;  %v1300_v26 = vmul.f32 %v3469_v11, %v4547_v50  ;;  %v4779_v53 = vpop.f32.mrf.mxu1  ;;  %v5056_v11 = vld [vmem:[#allocation41_spill] sm:$0xff] }
 0x1b9   :  { %v3473_v36 = vpop.eup %3472  ;;  %v1314_v43 = vadd.f32 %v1299_v56, %v1298_v37  ;;  %v755_v58 = vadd.f32 %v754_v39, %v740_v3  ;;  %v1027_v6 = vmul.f32 %v3471_v20, %v4731_v5  ;;  %v3155_v61 = vpop.f32.mrf.mxu0  ;;  %v5054_v5 = vld [vmem:[#allocation20_spill] sm:$0xff]  ;;  %3502 = vrcp.f32 %v4729_v49  ;;  %v5058_v49 = vld [vmem:[#allocation22_spill] sm:$0xff] }
 0x1ba   :  { %v1038_v41 = vadd.f32 %v1037_v4, %v1023_v44  ;;  %v3475_v48 = vpop.eup %3474  ;;  %v1301_v29 = vmul.f32 %v3473_v36, %v4562_v54  ;;  %v4787_v46 = vpop.permute.xlu0 %1577  ;;  %v745_v37 = vmul.f32 %v4748_v60, %v5056_v11  ;;  %v5057_v3 = vld [vmem:[#allocation28_spill] sm:$0xff]  ;;  %3504 = vrcp.f32 %v1189_v40 }
 0x1bb   :  { %v4761_v1 = vpop.permute.xlu1 %721  ;;  %v3477_v52 = vpop.eup %3476  ;;  %v756_v57 = vadd.f32 %v755_v58, %v741_v18  ;;  %v1315_v21 = vadd.f32 %v1314_v43, %v1300_v26  ;;  %v744_v25 = vmul.f32 %v3475_v48, %v5053_v59  ;;  %3506 = vrcp.f32 %v4758_v34 }
 0x1bc   :  { %2105 = vperm.xlu1 %3346, %v4351_v35   ;;  %v1039_v63 = vadd.f32 %v1038_v41, %v1024_v42  ;;  %v3479_v19 = vpop.eup %3478  ;;  %v4790_v8 = vpop.f32.mrf.mxu1 }
 0x1bd   :  { %v3481_v15 = vpop.eup %3480  ;;  %v1028_v51 = vmul.f32 %v3479_v19, %v5052_v17  ;;  %v757_v54 = vadd.f32 %v756_v57, %v742_v30  ;;  %v1316_v16 = vadd.f32 %v1315_v21, %v1301_v29  ;;  %v1199_v4 = vpop.f32.mrf.mxu0  ;;  %v747_v30 = vmul.f32 %v3477_v52, %v4761_v1  ;;  %v5062_v21 = vld [vmem:[#allocation33_spill] sm:$0xff] }
 0x1be   :  { %v1040_v50 = vadd.f32 %v1039_v63, %v1025_v2  ;;  %v3483_v62 = vpop.eup %3482  ;;  %v1302_v27 = vmul.f32 %v3481_v15, %v5055_v23  ;;  %v4799_v36 = vpop.f32.mrf.mxu1  ;;  %3508 = vrcp.f32 %v1199_v4 }
 0x1bf   :  { %v3485_v12 = vpop.eup %3484  ;;  %v758_v42 = vadd.f32 %v757_v54, %v743_v14  ;;  %v4804_v26 = vpop.permute.xlu0 %1803  ;;  %v5061_v14 = vld [vmem:[#allocation24_spill] sm:$0xff]  ;;  %3510 = vrcp.f32 %v3155_v61 }
 0x1c0   :  { %v1006_v28 = vpop.permute.xlu1 %1005  ;;  %2113 = vperm.xlu1 %3346, %v4374_v45   ;;  %v1041_v31 = vadd.f32 %v1040_v50, %v1026_v10  ;;  %v3487_v44 = vpop.eup %3486  ;;  %v1303_v20 = vmul.f32 %v3485_v12, %v5057_v3  ;;  %v1317_v48 = vadd.f32 %v1316_v16, %v1302_v27  ;;  %v5059_v10 = vld [vmem:[#allocation31_spill] sm:$0xff]  ;;  %v5063_v27 = vmov 6  }
 0x1c1   :  { %v3489_v13 = vpop.eup %3488  ;;  %v1029_v41 = vmul.f32 %v3483_v62, %v1006_v28  ;;  %v759_v56 = vadd.f32 %v758_v42, %v744_v25  ;;  %v746_v39 = vmul.f32 %v3487_v44, %v4746_v33  ;;  %v3158_v40 = vpop.f32.mrf.mxu0  ;;  %v5060_v33 = vld [vmem:[#allocation27_spill] sm:$0xff] }
 0x1c2   :  { %v1042_v55 = vadd.f32 %v1041_v31, %v1027_v6  ;;  %v3491_v9 = vpop.eup %3490  ;;  %v1031_v43 = vmul.f32 %v3489_v13, %v5059_v10  ;;  %v1318_v19 = vadd.f32 %v1317_v48, %v1303_v20  ;;  %v4809_v15 = vpop.f32.mrf.mxu1  ;;  %v5065_v13 = vld [vmem:[#allocation29_spill] sm:$0xff] }
 0x1c3   :  { %v3493_v2 = vpop.eup %3492  ;;  %v760_v58 = vadd.f32 %v759_v56, %v745_v37  ;;  %v4813_v54 = vpop.permute.xlu0 %1815 }
 0x1c4   :  { %2121 = vperm.xlu1 %3346, %v5054_v5   ;;  %v3495_v18 = vpop.eup %3494  ;;  %v1043_v60 = vadd.f32 %v1042_v55, %v1028_v51  ;;  %v1304_v29 = vmul.f32 %v3493_v2, %v5060_v33  ;;  %v1209_v51 = vpop.f32.mrf.mxu0 }
 0x1c5   :  { %v727_v24 = vpop.permute.xlu1 %726  ;;  %v3497_v63 = vpop.eup %3496  ;;  %v761_v34 = vadd.f32 %v760_v58, %v746_v39  ;;  %3512 = vrcp.f32 %v1209_v51  ;;  %v5066_v58 = vld [vmem:[#allocation32_spill] sm:$0xff] }
 0x1c6   :  { %v1044_v50 = vadd.f32 %v1043_v60, %v1029_v41  ;;  %v748_v57 = vmul.f32 %v3495_v18, %v727_v24  ;;  %v3499_v62 = vpop.eup %3498  ;;  %v1305_v31 = vmul.f32 %v3497_v63, %v5062_v21  ;;  %v1319_v52 = vadd.f32 %v1318_v19, %v1304_v29  ;;  %v4815_v44 = vpop.f32.mrf.mxu1  ;;  %v5064_v24 = vld [vmem:[#allocation15_spill] sm:$0xff] }
 0x1c7   :  { %v3501_v17 = vpop.eup %3500  ;;  %v762_v1 = vadd.f32 %v761_v34, %v747_v30  ;;  %3514 = vrcp.f32 %v3158_v40  ;;  %v4820_v2 = vpop.permute.xlu0 %1823  ;;  %v5067_v34 = vld [vmem:[#allocation16_spill] sm:$0xff] }
 0x1c8   :  { %2129 = vperm.xlu1 %3346, %v5058_v49   ;;  %v1320_v61 = vadd.f32 %v1319_v52, %v1305_v31  ;;  %v1306_v4 = vmul.f32 %v3501_v17, %v5065_v13  ;;  %v3503_v42 = vpop.eup %3502  ;;  %v1451_v11 = vpop.f32.mrf.mxu1  ;;  %3516 = vrcp.f32 %v4756_v32 }
 0x1c9   :  { %v763_v16 = vadd.f32 %v762_v1, %v748_v57  ;;  %v3505_v3 = vpop.eup %3504  ;;  %3518 = vrcp.f32 %v4772_v0  ;;  %v4830_v32 = vpop.f32.mrf.mxu0  ;;  %v5068_v0 = vld [vmem:[#allocation34_spill] sm:$0xff] }
 0x1ca   :  { %v1010_v28 = vpop.permute.xlu1 %1009  ;;  %v1321_v18 = vadd.f32 %v1320_v61, %v1306_v4  ;;  %v3507_v48 = vpop.eup %3506  ;;  %v1308_v30 = vmul.f32 %v3505_v3, %v5066_v58  ;;  %3520 = vrcp.f32 %v4790_v8 }
 0x1cb   :  { %v1030_v6 = vmul.f32 %v3491_v9, %v1010_v28  ;;  %v4824_v60 = vpop.f32.mrf.mxu1  ;;  %v3509_v10 = vpop.eup %3508  ;;  %3522 = vrcp.f32 %v4779_v53  ;;  %v5070_v53 = vld [vmem:[#allocation35_spill] sm:$0xff] }
 0x1cc   :  { %2137 = vperm.xlu1 %3346, %v5061_v14   ;;  %v3511_v57 = vpop.eup %3510  ;;  %v4832_v31 = vpop.permute.xlu0 %1831  ;;  %v1310_v51 = vmul.f32 %v3509_v10, %v5068_v0  ;;  %3524 = vrcp.f32 %v4809_v15 }
 0x1cd   :  { %v1045_v12 = vadd.f32 %v1044_v50, %v1030_v6  ;;  %v1461_v28 = vpop.f32.mrf.mxu1  ;;  %v4838_v4 = vpop.f32.mrf.mxu0  ;;  %3526 = vrcp.f32 %v4799_v36 }
 0x1ce   :  { %3528 = vrcp.f32 %v1451_v11 }
 0x1cf   :  { %v1046_v59 = vadd.f32 %v1045_v12, %v1031_v43  ;;  %v732_v25 = vpop.permute.xlu1 %731  ;;  %v3178_v52 = vpop.f32.mrf.mxu1  ;;  %3530 = vrcp.f32 %v4815_v44 }
 0x1d0   :  { %v749_v23 = vmul.f32 %v3499_v62, %v732_v25  ;;  %3347 = vset.pattern.permute.xlu1 %v5063_v27  ;;  %v1054_v62 = vld [vmem:[#allocation8 + $0x1] sm:$0x1]  ;;  %v4845_v15 = vpop.f32.mrf.mxu0  ;;  %3532 = vrcp.f32 %v1461_v28 }
 0x1d1   :  { %v1047_v55 = vrot.slane %v1046_v59, 4  ;;  %2363 = vperm.xlu1 %3347, %v5064_v24   ;;  %v1471_v3 = vpop.f32.mrf.mxu1  ;;  %3534 = vrcp.f32 %v4824_v60 }
 0x1d2   :  { %v764_v37 = vadd.f32 %v763_v16, %v749_v23  ;;  %v3513_v1 = vpop.eup %3512  ;;  %v772_v23 = vld [vmem:[#allocation8] sm:$0x1]  ;;  %3536 = vrcp.f32 %v1471_v3 }
 0x1d3   :  { %v1048_v9 = vadd.f32 %v1047_v55, %v1046_v59  ;;  %v5069_v55 = vmov 7   ;;  %3538 = vrcp.f32 %v3178_v52 }
 0x1d4   :  { %v765_v20 = vrot.slane %v764_v37, 4  ;;  %v1272_v41 = vpop.permute.xlu1 %1271  ;;  %v3515_v13 = vpop.eup %3514 }
 0x1d5   :  { %v1049_v56 = vrot.slane %v1048_v9, 2  ;;  %v1307_v39 = vmul.f32 %v3503_v42, %v1272_v41  ;;  %2371 = vperm.xlu1 %3347, %v4306_v38  }
 0x1d6   :  { %v766_v63 = vadd.f32 %v765_v20, %v764_v37 }
 0x1d7   :  { %v1050_v43 = vadd.f32 %v1049_v56, %v1048_v9  ;;  %v1322_v40 = vadd.f32 %v1321_v18, %v1307_v39  ;;  %v1312_v9 = vmul.f32 %v3513_v1, %v5070_v53  ;;  %v4843_v56 = vpop.permute.xlu0 %1839 }
 0x1d8   :  { %v767_v19 = vrot.slane %v766_v63, 2  ;;  %v1280_v33 = vpop.permute.xlu1 %1279 }
 0x1d9   :  { %v1051_v29 = vrot.slane %v1050_v43, 1  ;;  %v1309_v50 = vmul.f32 %v3507_v48, %v1280_v33  ;;  %v1323_v6 = vadd.f32 %v1322_v40, %v1308_v30  ;;  %2375 = vperm.xlu1 %3347, %v5067_v34   ;;  %v4849_v40 = vpop.f32.mrf.mxu0  ;;  %v5071_v33 = vld [vmem:[#allocation36_spill] sm:$0xff] }
 0x1da   :  { %v768_v21 = vadd.f32 %v767_v19, %v766_v63  ;;  %v3181_v63 = vpop.f32.mrf.mxu1 }
 0x1db   :  { %v1052_v12 = vadd.f32 %v1051_v29, %v1050_v43  ;;  %v1324_v17 = vadd.f32 %v1323_v6, %v1309_v50  ;;  %v4852_v30 = vpop.permute.xlu0 %1847 }
 0x1dc   :  { %v769_v59 = vrot.slane %v768_v21, 1  ;;  %v1288_v25 = vpop.permute.xlu1 %1287  ;;  %v1481_v29 = vpop.f32.mrf.mxu1 }
 0x1dd   :  { %v1055_v16 = vadd.f32 %v1054_v62, %v1052_v12  ;;  %v1311_v61 = vmul.f32 %v3511_v57, %v1288_v25  ;;  %v1325_v8 = vadd.f32 %v1324_v17, %v1310_v51  ;;  %3349 = vset.pattern.permute.xlu1 %v5069_v55  ;;  %v4856_v57 = vpop.f32.mrf.mxu0  ;;  %v5072_v12 = vld [vmem:[#allocation17_spill] sm:$0xff]  ;;  %3540 = vrcp.f32 %v1481_v29 }
 0x1de   :  { %v770_v42 = vadd.f32 %v769_v59, %v768_v21  ;;  %2645 = vperm.xlu1 %3349, %v5064_v24   ;;  %v3517_v24 = vpop.eup %3516  ;;  %v5073_v17 = vld [vmem:[#allocation37_spill] sm:$0xff]  ;;  %v3184_v51 = vpop.f32.mrf.mxu1  ;;  %3542 = vrcp.f32 %v3181_v63 }
 0x1df   :  { %1056 = vst [vmem:[#allocation10 + $0x1] sm:$0x1] %v1055_v16  ;;  %v1326_v37 = vadd.f32 %v1325_v8, %v1311_v61  ;;  %v3519_v10 = vpop.eup %3518  ;;  %v4861_v59 = vpop.permute.xlu0 %1855  ;;  %v1336_v61 = vld [vmem:[#allocation8 + $0x2] sm:$0x1] }
 0x1e0   :  { %v773_v20 = vadd.f32 %v772_v23, %v770_v42  ;;  %v1296_v41 = vpop.permute.xlu1 %1295  ;;  %v3521_v11 = vpop.eup %3520  ;;  %v5074_v42 = vld [vmem:[#allocation39_spill] sm:$0xff] }
 0x1e1   :  { %v1313_v39 = vmul.f32 %v3515_v13, %v1296_v41  ;;  %v1327_v18 = vadd.f32 %v1326_v37, %v1312_v9  ;;  %v3523_v44 = vpop.eup %3522  ;;  %v4863_v23 = vpop.f32.mrf.mxu0 }
 0x1e2   :  { %774 = vst [vmem:[#allocation10] sm:$0x1] %v773_v20  ;;  %2653 = vperm.xlu1 %3349, %v4306_v38   ;;  %v1580_v38 = vmul.f32 %v3519_v10, %v5071_v33  ;;  %v1583_v0 = vmul.f32 %v3523_v44, %v5073_v17  ;;  %v1491_v9 = vpop.f32.mrf.mxu1  ;;  %v5075_v10 = vld [vmem:[#allocation18_spill] sm:$0xff] }
 0x1e3   :  { %v1328_v48 = vadd.f32 %v1327_v18, %v1313_v39  ;;  %v4867_v41 = vpop.f32.mrf.mxu0  ;;  %3544 = vrcp.f32 %v1491_v9 }
 0x1e4   :  { %3546 = vrcp.f32 %v3184_v51 }
 0x1e5   :  { %v1329_v36 = vrot.slane %v1328_v48, 4  ;;  %v1522_v43 = vpop.permute.xlu1 %1521  ;;  %3548 = vrcp.f32 %v4838_v4 }
 0x1e6   :  { %v1581_v58 = vmul.f32 %v3517_v24, %v1522_v43  ;;  %2657 = vperm.xlu1 %3349, %v5067_v34   ;;  %v3525_v34 = vpop.eup %3524  ;;  %3550 = vrcp.f32 %v4830_v32 }
 0x1e7   :  { %v1330_v19 = vadd.f32 %v1329_v36, %v1328_v48  ;;  %v3527_v1 = vpop.eup %3526  ;;  %v4869_v48 = vpop.permute.xlu0 %2081  ;;  %3552 = vrcp.f32 %v4849_v40 }
 0x1e8   :  { %v1596_v62 = vadd.f32 %v1581_v58, %v1580_v38  ;;  %v3529_v55 = vpop.eup %3528  ;;  %v1585_v37 = vmul.f32 %v3527_v1, %v5074_v42  ;;  %3554 = vrcp.f32 %v4845_v15 }
 0x1e9   :  { %v1331_v50 = vrot.slane %v1330_v19, 2  ;;  %v1526_v6 = vpop.permute.xlu1 %1525  ;;  %v3531_v53 = vpop.eup %3530  ;;  %3556 = vrcp.f32 %v4863_v23 }
 0x1ea   :  { %v1582_v28 = vmul.f32 %v3521_v11, %v1526_v6  ;;  %3351 = vset.pattern.permute.xlu1 %v5063_v27  ;;  %v3533_v24 = vpop.eup %3532  ;;  %v1733_v11 = vpop.f32.mrf.mxu0  ;;  %3558 = vrcp.f32 %v4856_v57 }
 0x1eb   :  { %v1332_v21 = vadd.f32 %v1331_v50, %v1330_v19  ;;  %2383 = vperm.xlu1 %3351, %v5072_v12   ;;  %v3535_v43 = vpop.eup %3534  ;;  %v4873_v19 = vpop.f32.mrf.mxu1  ;;  %3560 = vrcp.f32 %v1733_v11 }
 0x1ec   :  { %v1597_v60 = vadd.f32 %v1596_v62, %v1582_v28  ;;  %v3537_v29 = vpop.eup %3536  ;;  %v1589_v50 = vmul.f32 %v3535_v43, %v4725_v47  ;;  %v4878_v62 = vpop.permute.xlu0 %2093  ;;  %3562 = vrcp.f32 %v4867_v41 }
 0x1ed   :  { %v1333_v25 = vrot.slane %v1332_v21, 1  ;;  %v1534_v16 = vpop.permute.xlu1 %1533  ;;  %v3539_v6 = vpop.eup %3538 }
 0x1ee   :  { %v1584_v8 = vmul.f32 %v3525_v34, %v1534_v16  ;;  %v1598_v27 = vadd.f32 %v1597_v60, %v1583_v0  ;;  %v3201_v34 = vpop.f32.mrf.mxu0  ;;  %v3541_v0 = vpop.eup %3540  ;;  %v1591_v4 = vmul.f32 %v3539_v6, %v4744_v7 }
 0x1ef   :  { %v1334_v13 = vadd.f32 %v1333_v25, %v1332_v21  ;;  %2387 = vperm.xlu1 %3351, %v4351_v35   ;;  %v5076_v35 = vld [vmem:[#allocation40_spill] sm:$0xff]  ;;  %v4881_v21 = vpop.f32.mrf.mxu1  ;;  %v3543_v60 = vpop.eup %3542 }
 0x1f0   :  { %v1599_v52 = vadd.f32 %v1598_v27, %v1584_v8  ;;  %v1587_v36 = vmul.f32 %v3531_v53, %v5076_v35  ;;  %v1743_v25 = vpop.f32.mrf.mxu0  ;;  %v4889_v8 = vpop.permute.xlu0 %2101  ;;  %v5078_v53 = vld [vmem:[#allocation21_spill] sm:$0xff] }
 0x1f1   :  { %v1337_v3 = vadd.f32 %v1336_v61, %v1334_v13  ;;  %v1542_v20 = vpop.permute.xlu1 %1541  ;;  %v4885_v51 = vpop.f32.mrf.mxu1  ;;  %3564 = vrcp.f32 %v1743_v25 }
 0x1f2   :  { %v1586_v39 = vmul.f32 %v3529_v55, %v1542_v20  ;;  %v1600_v18 = vadd.f32 %v1599_v52, %v1585_v37  ;;  %v3545_v61 = vpop.eup %3544  ;;  %v1593_v55 = vmul.f32 %v3543_v60, %v4768_v22  ;;  %v3204_v42 = vpop.f32.mrf.mxu0  ;;  %3566 = vrcp.f32 %v3201_v34  ;;  %v1618_v60 = vld [vmem:[#allocation8 + $0x3] sm:$0x1] }
 0x1f3   :  { %1338 = vst [vmem:[#allocation10 + $0x2] sm:$0x1] %v1337_v3  ;;  %2391 = vperm.xlu1 %3351, %v5075_v10   ;;  %v4892_v40 = vpop.f32.mrf.mxu1  ;;  %v3547_v13 = vpop.eup %3546 }
 0x1f4   :  { %v1601_v63 = vadd.f32 %v1600_v18, %v1586_v39  ;;  %v4901_v3 = vpop.permute.xlu0 %2109  ;;  %v3549_v22 = vpop.eup %3548 }
 0x1f5   :  { %v1550_v58 = vpop.permute.xlu1 %1549  ;;  %v4898_v15 = vpop.f32.mrf.mxu1 }
 0x1f6   :  { %v1588_v33 = vmul.f32 %v3533_v24, %v1550_v58  ;;  %v1602_v38 = vadd.f32 %v1601_v63, %v1587_v36  ;;  %v1753_v20 = vpop.f32.mrf.mxu0  ;;  %v3551_v18 = vpop.eup %3550 }
 0x1f7   :  { %2395 = vperm.xlu1 %3351, %v4374_v45   ;;  %v5077_v45 = vld [vmem:[#allocation19_spill] sm:$0xff]  ;;  %v3553_v57 = vpop.eup %3552  ;;  %v4905_v10 = vpop.f32.mrf.mxu1  ;;  %v1863_v43 = vmul.f32 %v3551_v18, %v4804_v26  ;;  %3568 = vrcp.f32 %v1753_v20 }
 0x1f8   :  { %v1603_v44 = vadd.f32 %v1602_v38, %v1588_v33  ;;  %v3207_v24 = vpop.f32.mrf.mxu0  ;;  %v4908_v58 = vpop.permute.xlu0 %2117  ;;  %v5079_v33 = vld [vmem:[#allocation23_spill] sm:$0xff]  ;;  %3570 = vrcp.f32 %v3204_v42 }
 0x1f9   :  { %v1558_v28 = vpop.permute.xlu1 %1557  ;;  %v3555_v41 = vpop.eup %3554 }
 0x1fa   :  { %v1590_v12 = vmul.f32 %v3537_v29, %v1558_v28  ;;  %v1604_v17 = vadd.f32 %v1603_v44, %v1589_v50  ;;  %v1763_v38 = vpop.f32.mrf.mxu0  ;;  %v3557_v50 = vpop.eup %3556 }
 0x1fb   :  { %2399 = vperm.xlu1 %3351, %v5077_v45   ;;  %v3559_v26 = vpop.eup %3558  ;;  %3572 = vrcp.f32 %v1763_v38 }
 0x1fc   :  { %v1605_v47 = vadd.f32 %v1604_v17, %v1590_v12  ;;  %v3210_v6 = vpop.f32.mrf.mxu0  ;;  %v3561_v25 = vpop.eup %3560  ;;  %3574 = vrcp.f32 %v3207_v24 }
 0x1fd   :  { %v1566_v1 = vpop.permute.xlu1 %1565 }
 0x1fe   :  { %v1592_v16 = vmul.f32 %v3541_v0, %v1566_v1  ;;  %v1606_v32 = vadd.f32 %v1605_v47, %v1591_v4  ;;  %v1866_v47 = vmul.f32 %v3557_v50, %v4813_v54  ;;  %v4917_v4 = vpop.permute.xlu0 %2125  ;;  %v1868_v54 = vmul.f32 %v3561_v25, %v4820_v2 }
 0x1ff   :  { %2403 = vperm.xlu1 %3351, %v5054_v5   ;;  %v1595_v5 = vmul.f32 %v3547_v13, %v4787_v46  ;;  %v5080_v13 = vld [vmem:[#allocation25_spill] sm:$0xff] }
 0x200   :  { %v1607_v27 = vadd.f32 %v1606_v32, %v1592_v16  ;;  %v1773_v16 = vpop.f32.mrf.mxu0 }
 0x201   :  { %v1574_v7 = vpop.permute.xlu1 %1573  ;;  %3576 = vrcp.f32 %v1773_v16 }
 0x202   :  { %v1594_v37 = vmul.f32 %v3545_v61, %v1574_v7  ;;  %v1608_v52 = vadd.f32 %v1607_v27, %v1593_v55  ;;  %3578 = vrcp.f32 %v3210_v6 }
 0x203   :  { %2407 = vperm.xlu1 %3351, %v5078_v53   ;;  %3580 = vrcp.f32 %v4873_v19 }
 0x204   :  { %v1609_v9 = vadd.f32 %v1608_v52, %v1594_v37  ;;  %3582 = vrcp.f32 %v4881_v21 }
 0x205   :  { %3584 = vrcp.f32 %v4892_v40 }
 0x206   :  { %v1610_v39 = vadd.f32 %v1609_v9, %v1595_v5  ;;  %v1800_v23 = vpop.permute.xlu1 %1799  ;;  %v4923_v5 = vpop.permute.xlu0 %2133  ;;  %3586 = vrcp.f32 %v4885_v51 }
 0x207   :  { %2411 = vperm.xlu1 %3351, %v5058_v49   ;;  %v1862_v46 = vmul.f32 %v3549_v22, %v1800_v23  ;;  %v4911_v49 = vpop.f32.mrf.mxu1  ;;  %3588 = vrcp.f32 %v4905_v10 }
 0x208   :  { %v1611_v35 = vrot.slane %v1610_v39, 4  ;;  %3590 = vrcp.f32 %v4898_v15 }
 0x209   :  { %v1878_v44 = vadd.f32 %v1863_v43, %v1862_v46  ;;  %v4914_v0 = vpop.f32.mrf.mxu1 }
 0x20a   :  { %v1612_v36 = vadd.f32 %v1611_v35, %v1610_v39  ;;  %v1808_v63 = vpop.permute.xlu1 %1807  ;;  %v4928_v43 = vpop.permute.xlu0 %2141  ;;  %3592 = vrcp.f32 %v4914_v0 }
 0x20b   :  { %v1864_v11 = vmul.f32 %v3553_v57, %v1808_v63  ;;  %2415 = vperm.xlu1 %3351, %v5079_v33   ;;  %v4920_v7 = vpop.f32.mrf.mxu1 }
 0x20c   :  { %v1613_v29 = vrot.slane %v1612_v36, 2 }
 0x20d   :  { %v1879_v34 = vadd.f32 %v1878_v44, %v1864_v11  ;;  %v2025_v39 = vpop.f32.mrf.mxu1 }
 0x20e   :  { %v1614_v28 = vadd.f32 %v1613_v29, %v1612_v36  ;;  %v1812_v12 = vpop.permute.xlu1 %1811 }
 0x20f   :  { %v1865_v17 = vmul.f32 %v3555_v41, %v1812_v12  ;;  %2419 = vperm.xlu1 %3351, %v5061_v14   ;;  %v3563_v14 = vpop.eup %3562  ;;  %v3230_v36 = vpop.f32.mrf.mxu1  ;;  %3594 = vrcp.f32 %v4911_v49 }
 0x210   :  { %v1615_v45 = vrot.slane %v1614_v28, 1  ;;  %v3565_v52 = vpop.eup %3564  ;;  %3596 = vrcp.f32 %v2025_v39 }
 0x211   :  { %v1880_v1 = vadd.f32 %v1879_v34, %v1865_v17  ;;  %v3567_v20 = vpop.eup %3566  ;;  %v1870_v23 = vmul.f32 %v3565_v52, %v4832_v31  ;;  %v2035_v44 = vpop.f32.mrf.mxu1  ;;  %3598 = vrcp.f32 %v4920_v7 }
 0x212   :  { %v1616_v32 = vadd.f32 %v1615_v45, %v1614_v28  ;;  %v1820_v61 = vpop.permute.xlu1 %1819  ;;  %v3569_v57 = vpop.eup %3568  ;;  %3600 = vrcp.f32 %v2035_v44 }
 0x213   :  { %v1867_v27 = vmul.f32 %v3559_v26, %v1820_v61  ;;  %v1881_v55 = vadd.f32 %v1880_v1, %v1866_v47  ;;  %2423 = vperm.xlu1 %3351, %v5080_v13   ;;  %v3571_v2 = vpop.eup %3570  ;;  %v1872_v63 = vmul.f32 %v3569_v57, %v4843_v56  ;;  %v4934_v28 = vpop.permute.xlu0 %2367  ;;  %3602 = vrcp.f32 %v3230_v36 }
 0x214   :  { %v1619_v42 = vadd.f32 %v1618_v60, %v1616_v32  ;;  %v3573_v33 = vpop.eup %3572  ;;  %v3233_v21 = vpop.f32.mrf.mxu1 }
 0x215   :  { %v1882_v37 = vadd.f32 %v1881_v55, %v1867_v27  ;;  %v3575_v29 = vpop.eup %3574  ;;  %v1874_v50 = vmul.f32 %v3573_v33, %v4852_v30 }
 0x216   :  { %1620 = vst [vmem:[#allocation10 + $0x3] sm:$0x1] %v1619_v42  ;;  %v1828_v53 = vpop.permute.xlu1 %1827  ;;  %v3577_v19 = vpop.eup %3576 }
 0x217   :  { %v1869_v9 = vmul.f32 %v3563_v14, %v1828_v53  ;;  %v1883_v22 = vadd.f32 %v1882_v37, %v1868_v54  ;;  %v3579_v17 = vpop.eup %3578  ;;  %v1876_v45 = vmul.f32 %v3577_v19, %v4861_v59  ;;  %v2045_v51 = vpop.f32.mrf.mxu1 }
 0x218   :  { %v3581_v60 = vpop.eup %3580  ;;  %v4940_v1 = vpop.permute.xlu0 %2379  ;;  %3604 = vrcp.f32 %v2045_v51 }
 0x219   :  { %v1884_v18 = vadd.f32 %v1883_v22, %v1869_v9  ;;  %v3583_v16 = vpop.eup %3582  ;;  %v3236_v61 = vpop.f32.mrf.mxu1  ;;  %3606 = vrcp.f32 %v3233_v21 }
 0x21a   :  { %v1836_v24 = vpop.permute.xlu1 %1835  ;;  %v3585_v27 = vpop.eup %3584  ;;  %v2144_v55 = vmul.f32 %v3583_v16, %v4869_v48 }
 0x21b   :  { %v1871_v35 = vmul.f32 %v3567_v20, %v1836_v24  ;;  %v1885_v46 = vadd.f32 %v1884_v18, %v1870_v23  ;;  %v2055_v0 = vpop.f32.mrf.mxu1  ;;  %v3587_v13 = vpop.eup %3586  ;;  %v1900_v23 = vld [vmem:[#allocation8 + $0x4] sm:$0x1] }
 0x21c   :  { %v4945_v14 = vpop.permute.xlu0 %2649  ;;  %v3589_v52 = vpop.eup %3588  ;;  %v2147_v9 = vmul.f32 %v3587_v13, %v4878_v62  ;;  %3608 = vrcp.f32 %v2055_v0 }
 0x21d   :  { %v1886_v11 = vadd.f32 %v1885_v46, %v1871_v35  ;;  %v4948_v22 = vpop.f32.mrf.mxu1  ;;  %v3591_v48 = vpop.eup %3590  ;;  %3610 = vrcp.f32 %v3236_v61 }
 0x21e   :  { %v1844_v41 = vpop.permute.xlu1 %1843  ;;  %v3593_v24 = vpop.eup %3592 }
 0x21f   :  { %v1873_v38 = vmul.f32 %v3571_v2, %v1844_v41  ;;  %v1887_v31 = vadd.f32 %v1886_v11, %v1872_v63  ;;  %v2149_v2 = vmul.f32 %v3591_v48, %v4889_v8  ;;  %v2549_v63 = vpop.f32.mrf.mxu1  ;;  %v3595_v36 = vpop.eup %3594 }
 0x220   :  { %v4950_v35 = vpop.permute.xlu0 %2661  ;;  %3612 = vrcp.f32 %v2549_v63 }
 0x221   :  { %v1888_v6 = vadd.f32 %v1887_v31, %v1873_v38  ;;  %v3597_v31 = vpop.eup %3596  ;;  %v3270_v44 = vpop.f32.mrf.mxu1  ;;  %3614 = vrcp.f32 %v4948_v22 }
 0x222   :  { %v1852_v56 = vpop.permute.xlu1 %1851 }
 0x223   :  { %v1875_v12 = vmul.f32 %v3575_v29, %v1852_v56  ;;  %v1889_v34 = vadd.f32 %v1888_v6, %v1874_v50  ;;  %v2151_v29 = vmul.f32 %v3595_v36, %v4901_v3  ;;  %v3599_v6 = vpop.eup %3598  ;;  %v2559_v21 = vpop.f32.mrf.mxu1 }
 0x224   :  { %v4954_v19 = vpop.permute.xlu0 %2665  ;;  %3616 = vrcp.f32 %v2559_v21 }
 0x225   :  { %v1890_v26 = vadd.f32 %v1889_v34, %v1875_v12  ;;  %v3601_v34 = vpop.eup %3600  ;;  %3618 = vrcp.f32 %v3270_v44 }
 0x226   :  { %v1860_v40 = vpop.permute.xlu1 %1859 }
 0x227   :  { %v1877_v30 = vmul.f32 %v3579_v17, %v1860_v40  ;;  %v1891_v47 = vadd.f32 %v1890_v26, %v1876_v45  ;;  %v2153_v17 = vmul.f32 %v3599_v6, %v4908_v58  ;;  %v3603_v45 = vpop.eup %3602 }
 0x228   :  { %v3605_v51 = vpop.eup %3604  ;;  %v4957_v3 = vpop.permute.xlu0 %2669 }
 0x229   :  { %v1892_v25 = vadd.f32 %v1891_v47, %v1877_v30 }
 0x22b   :  { %v1893_v10 = vrot.slane %v1892_v25, 4  ;;  %v2086_v32 = vpop.permute.xlu1 %2085 }
 0x22c   :  { %v2145_v59 = vmul.f32 %v3581_v60, %v2086_v32  ;;  %v2155_v60 = vmul.f32 %v3603_v45, %v4917_v4 }
 0x22d   :  { %v1894_v15 = vadd.f32 %v1893_v10, %v1892_v25  ;;  %v3273_v25 = vpop.f32.mrf.mxu1  ;;  %v3607_v10 = vpop.eup %3606 }
 0x22e   :  { %v2160_v49 = vadd.f32 %v2145_v59, %v2144_v55  ;;  %v2157_v58 = vmul.f32 %v3607_v10, %v4923_v5 }
 0x22f   :  { %v1895_v42 = vrot.slane %v1894_v15, 2  ;;  %v2090_v54 = vpop.permute.xlu1 %2089  ;;  %v2569_v55 = vpop.f32.mrf.mxu1 }
 0x230   :  { %v2146_v37 = vmul.f32 %v3585_v27, %v2090_v54  ;;  %v3609_v27 = vpop.eup %3608  ;;  %3620 = vrcp.f32 %v2569_v55 }
 0x231   :  { %v1896_v53 = vadd.f32 %v1895_v42, %v1894_v15  ;;  %v3241_v15 = vpop.f32.mrf.mxu0  ;;  %v3611_v13 = vpop.eup %3610  ;;  %3622 = vrcp.f32 %v3273_v25 }
 0x232   :  { %v2161_v20 = vadd.f32 %v2160_v49, %v2146_v37  ;;  %v4961_v42 = vpop.permute.xlu0 %2673  ;;  %v3276_v49 = vpop.f32.mrf.mxu1 }
 0x233   :  { %v1897_v39 = vrot.slane %v1896_v53, 1  ;;  %v2098_v7 = vpop.permute.xlu1 %2097  ;;  %v2267_v4 = vpop.f32.mrf.mxu0 }
 0x234   :  { %v2148_v18 = vmul.f32 %v3589_v52, %v2098_v7  ;;  %v2162_v57 = vadd.f32 %v2161_v20, %v2147_v9  ;;  %v2579_v20 = vpop.f32.mrf.mxu1 }
 0x235   :  { %v1898_v46 = vadd.f32 %v1897_v39, %v1896_v53  ;;  %v2159_v53 = vmul.f32 %v3611_v13, %v4928_v43  ;;  %v3244_v7 = vpop.f32.mrf.mxu0  ;;  %3624 = vrcp.f32 %v2579_v20 }
 0x236   :  { %v2163_v62 = vadd.f32 %v2162_v57, %v2148_v18  ;;  %v4967_v5 = vpop.permute.xlu0 %2677  ;;  %3626 = vrcp.f32 %v3276_v49 }
 0x237   :  { %v1901_v11 = vadd.f32 %v1900_v23, %v1898_v46  ;;  %v2106_v33 = vpop.permute.xlu1 %2105  ;;  %v3279_v23 = vpop.f32.mrf.mxu1 }
 0x238   :  { %v2150_v41 = vmul.f32 %v3593_v24, %v2106_v33  ;;  %v2164_v38 = vadd.f32 %v2163_v62, %v2149_v2  ;;  %v2277_v46 = vpop.f32.mrf.mxu0 }
 0x239   :  { %1902 = vst [vmem:[#allocation10 + $0x4] sm:$0x1] %v1901_v11  ;;  %v2589_v43 = vpop.f32.mrf.mxu1 }
 0x23a   :  { %v2165_v50 = vadd.f32 %v2164_v38, %v2150_v41  ;;  %v4971_v63 = vpop.permute.xlu0 %2681  ;;  %v3247_v22 = vpop.f32.mrf.mxu0  ;;  %v2182_v41 = vld [vmem:[#allocation8 + $0x5] sm:$0x1]  ;;  %3628 = vrcp.f32 %v2589_v43 }
 0x23b   :  { %v2114_v8 = vpop.permute.xlu1 %2113  ;;  %v3282_v62 = vpop.f32.mrf.mxu1  ;;  %3630 = vrcp.f32 %v3241_v15 }
 0x23c   :  { %v2152_v56 = vmul.f32 %v3597_v31, %v2114_v8  ;;  %v2166_v12 = vadd.f32 %v2165_v50, %v2151_v29  ;;  %v3613_v29 = vpop.eup %3612  ;;  %v2287_v8 = vpop.f32.mrf.mxu0  ;;  %3632 = vrcp.f32 %v3279_v23 }
 0x23d   :  { %v2599_v38 = vpop.f32.mrf.mxu1  ;;  %v3615_v6 = vpop.eup %3614  ;;  %3634 = vrcp.f32 %v2267_v4 }
 0x23e   :  { %v2167_v26 = vadd.f32 %v2166_v12, %v2152_v56  ;;  %v4975_v50 = vpop.permute.xlu0 %2685  ;;  %v3617_v12 = vpop.eup %3616  ;;  %v2709_v45 = vmul.f32 %v3615_v6, %v4945_v14  ;;  %3636 = vrcp.f32 %v2599_v38 }
 0x23f   :  { %v2122_v40 = vpop.permute.xlu1 %2121  ;;  %v3250_v21 = vpop.f32.mrf.mxu0  ;;  %3638 = vrcp.f32 %v2277_v46 }
 0x240   :  { %v2154_v30 = vmul.f32 %v3601_v34, %v2122_v40  ;;  %v2168_v47 = vadd.f32 %v2167_v26, %v2153_v17  ;;  %v3285_v34 = vpop.f32.mrf.mxu1  ;;  %3640 = vrcp.f32 %v3282_v62 }
 0x241   :  { %v2297_v25 = vpop.f32.mrf.mxu0  ;;  %3642 = vrcp.f32 %v3244_v7 }
 0x242   :  { %v2169_v16 = vadd.f32 %v2168_v47, %v2154_v30  ;;  %v3619_v30 = vpop.eup %3618  ;;  %v2609_v47 = vpop.f32.mrf.mxu1 }
 0x243   :  { %v2130_v32 = vpop.permute.xlu1 %2129  ;;  %3644 = vrcp.f32 %v2609_v47 }
 0x244   :  { %v2156_v61 = vmul.f32 %v3605_v51, %v2130_v32  ;;  %v2170_v59 = vadd.f32 %v2169_v16, %v2155_v60  ;;  %v4978_v51 = vpop.permute.xlu0 %2689  ;;  %v3621_v16 = vpop.eup %3620  ;;  %3646 = vrcp.f32 %v3285_v34 }
 0x245   :  { %v3288_v10 = vpop.f32.mrf.mxu1  ;;  %v3623_v15 = vpop.eup %3622  ;;  %v2712_v14 = vmul.f32 %v3621_v16, %v4950_v35  ;;  %3648 = vrcp.f32 %v3247_v22 }
 0x246   :  { %v2171_v0 = vadd.f32 %v2170_v59, %v2156_v61  ;;  %v3625_v55 = vpop.eup %3624 }
 0x247   :  { %v2138_v54 = vpop.permute.xlu1 %2137  ;;  %v3627_v4 = vpop.eup %3626 }
 0x248   :  { %v2158_v37 = vmul.f32 %v3609_v27, %v2138_v54  ;;  %v2172_v52 = vadd.f32 %v2171_v0, %v2157_v58  ;;  %v3253_v27 = vpop.f32.mrf.mxu0  ;;  %v2619_v0 = vpop.f32.mrf.mxu1  ;;  %v2713_v54 = vmul.f32 %v3623_v15, %v4954_v19  ;;  %v2715_v7 = vmul.f32 %v3627_v4, %v4961_v42 }
 0x249   :  { %v2694_v13 = vpop.permute.xlu0 %2693  ;;  %3650 = vrcp.f32 %v2619_v0  ;;  %v3629_v35 = vpop.eup %3628 }
 0x24a   :  { %v2173_v9 = vadd.f32 %v2172_v52, %v2158_v37  ;;  %v2307_v37 = vpop.f32.mrf.mxu0  ;;  %3652 = vrcp.f32 %v2287_v8  ;;  %v2716_v43 = vmul.f32 %v3629_v35, %v4967_v5 }
 0x24b   :  { %3654 = vrcp.f32 %v3288_v10 }
 0x24c   :  { %v2174_v48 = vadd.f32 %v2173_v9, %v2159_v53  ;;  %v4964_v39 = vpop.permute.xlu1 %2363  ;;  %v2714_v53 = vmul.f32 %v3625_v55, %v4957_v3  ;;  %v3256_v20 = vpop.f32.mrf.mxu0  ;;  %3656 = vrcp.f32 %v2297_v25 }
 0x24d   :  { %3658 = vrcp.f32 %v3250_v21 }
 0x24e   :  { %v2175_v18 = vrot.slane %v2174_v48, 4  ;;  %v2317_v62 = vpop.f32.mrf.mxu0  ;;  %3660 = vrcp.f32 %v2307_v37 }
 0x250   :  { %v2176_v57 = vadd.f32 %v2175_v18, %v2174_v48  ;;  %v4969_v24 = vpop.permute.xlu1 %2371  ;;  %v3631_v48 = vpop.eup %3630  ;;  %3662 = vrcp.f32 %v3253_v27 }
 0x251   :  { %v3633_v18 = vpop.eup %3632  ;;  %v3259_v38 = vpop.f32.mrf.mxu0  ;;  %v2427_v5 = vmul.f32 %v3631_v48, %v4934_v28  ;;  %3664 = vrcp.f32 %v2317_v62 }
 0x252   :  { %v2177_v2 = vrot.slane %v2176_v57, 2  ;;  %v3635_v46 = vpop.eup %3634  ;;  %v2717_v22 = vmul.f32 %v3633_v18, %v4971_v63  ;;  %3666 = vrcp.f32 %v3256_v20 }
 0x253   :  { %v3637_v3 = vpop.eup %3636  ;;  %v2327_v21 = vpop.f32.mrf.mxu0 }
 0x254   :  { %v2178_v36 = vadd.f32 %v2177_v2, %v2176_v57  ;;  %v4973_v11 = vpop.permute.xlu1 %2375  ;;  %v2698_v57 = vpop.permute.xlu0 %2697  ;;  %3668 = vrcp.f32 %v2327_v21 }
 0x255   :  { %v3262_v47 = vpop.f32.mrf.mxu0 }
 0x256   :  { %v2179_v33 = vrot.slane %v2178_v36, 1 }
 0x258   :  { %v2180_v31 = vadd.f32 %v2179_v33, %v2178_v36  ;;  %v3639_v36 = vpop.eup %3638  ;;  %3670 = vrcp.f32 %v3259_v38 }
 0x259   :  { %v2646_v44 = vpop.permute.xlu1 %2645  ;;  %v3641_v42 = vpop.eup %3640 }
 0x25a   :  { %v2183_v56 = vadd.f32 %v2182_v41, %v2180_v31  ;;  %v2708_v17 = vmul.f32 %v3613_v29, %v2646_v44  ;;  %v2426_v31 = vmul.f32 %v3635_v46, %v4964_v39  ;;  %v3643_v29 = vpop.eup %3642  ;;  %v2718_v44 = vmul.f32 %v3637_v3, %v4975_v50 }
 0x25b   :  { %v3645_v8 = vpop.eup %3644  ;;  %v2719_v63 = vmul.f32 %v3641_v42, %v4978_v51  ;;  %v2429_v39 = vmul.f32 %v3643_v29, %v4973_v11  ;;  %v2337_v11 = vpop.f32.mrf.mxu0 }
 0x25c   :  { %2184 = vst [vmem:[#allocation10 + $0x5] sm:$0x1] %v2183_v56  ;;  %v2724_v60 = vadd.f32 %v2709_v45, %v2708_v17  ;;  %v2702_v56 = vpop.permute.xlu0 %2701  ;;  %v2442_v45 = vadd.f32 %v2427_v5, %v2426_v31  ;;  %v2720_v50 = vmul.f32 %v3645_v8, %v2694_v13  ;;  %3672 = vrcp.f32 %v2337_v11 }
 0x25d   :  { %v2654_v26 = vpop.permute.xlu1 %2653  ;;  %3674 = vrcp.f32 %v3262_v47 }
 0x25e   :  { %v2710_v40 = vmul.f32 %v3617_v12, %v2654_v26  ;;  %v2428_v12 = vmul.f32 %v3639_v36, %v4969_v24  ;;  %v3647_v26 = vpop.eup %3646 }
 0x25f   :  { %v2721_v24 = vmul.f32 %v3647_v26, %v2698_v57 }
 0x260   :  { %v2725_v61 = vadd.f32 %v2724_v60, %v2710_v40  ;;  %v3649_v40 = vpop.eup %3648  ;;  %v2443_v28 = vadd.f32 %v2442_v45, %v2428_v12 }
 0x261   :  { %v2658_v32 = vpop.permute.xlu1 %2657  ;;  %v3651_v60 = vpop.eup %3650 }
 0x262   :  { %v2711_v59 = vmul.f32 %v3619_v30, %v2658_v32  ;;  %v3653_v25 = vpop.eup %3652  ;;  %v2706_v32 = vpop.permute.xlu0 %2705  ;;  %v2722_v27 = vmul.f32 %v3651_v60, %v2702_v56 }
 0x263   :  { %v3655_v51 = vpop.eup %3654 }
 0x264   :  { %v2726_v58 = vadd.f32 %v2725_v61, %v2711_v59  ;;  %v2444_v61 = vadd.f32 %v2443_v28, %v2429_v39  ;;  %v3657_v59 = vpop.eup %3656  ;;  %v2723_v0 = vmul.f32 %v3655_v51, %v2706_v32 }
 0x265   :  { %v3659_v55 = vpop.eup %3658 }
 0x266   :  { %v2727_v49 = vadd.f32 %v2726_v58, %v2712_v14  ;;  %v4982_v52 = vpop.permute.xlu1 %2383  ;;  %v2430_v14 = vmul.f32 %v3653_v25, %v4940_v1  ;;  %v3661_v4 = vpop.eup %3660 }
 0x267   :  { %v2431_v58 = vmul.f32 %v3649_v40, %v4982_v52  ;;  %v3663_v35 = vpop.eup %3662 }
 0x268   :  { %v2728_v9 = vadd.f32 %v2727_v49, %v2713_v54  ;;  %v2445_v49 = vadd.f32 %v2444_v61, %v2430_v14  ;;  %v3665_v1 = vpop.eup %3664 }
 0x26a   :  { %v2729_v23 = vadd.f32 %v2728_v9, %v2714_v53  ;;  %v2388_v19 = vpop.permute.xlu1 %2387  ;;  %v2446_v9 = vadd.f32 %v2445_v49, %v2431_v58 }
 0x26b   :  { %v2432_v37 = vmul.f32 %v3657_v59, %v2388_v19 }
 0x26c   :  { %v2730_v2 = vadd.f32 %v2729_v23, %v2715_v7 }
 0x26d   :  { %v2447_v23 = vadd.f32 %v2446_v9, %v2432_v37 }
 0x26e   :  { %v2731_v33 = vadd.f32 %v2730_v2, %v2716_v43  ;;  %v2392_v41 = vpop.permute.xlu1 %2391  ;;  %v3667_v43 = vpop.eup %3666 }
 0x26f   :  { %v2433_v20 = vmul.f32 %v3659_v55, %v2392_v41  ;;  %v3669_v36 = vpop.eup %3668 }
 0x270   :  { %v2732_v6 = vadd.f32 %v2731_v33, %v2717_v22  ;;  %v3671_v41 = vpop.eup %3670 }
 0x271   :  { %v2448_v52 = vadd.f32 %v2447_v23, %v2433_v20  ;;  %v3673_v8 = vpop.eup %3672 }
 0x272   :  { %v2733_v34 = vadd.f32 %v2732_v6, %v2718_v44  ;;  %v2396_v17 = vpop.permute.xlu1 %2395  ;;  %v2746_v6 = vld [vmem:[#allocation8 + $0x7] sm:$0x1]  ;;  %v3675_v45 = vpop.eup %3674 }
 0x273   :  { %v2434_v18 = vmul.f32 %v3661_v4, %v2396_v17 }
 0x274   :  { %v2734_v30 = vadd.f32 %v2733_v34, %v2719_v63 }
 0x275   :  { %v2449_v3 = vadd.f32 %v2448_v52, %v2434_v18 }
 0x276   :  { %v2735_v16 = vadd.f32 %v2734_v30, %v2720_v50  ;;  %v2400_v10 = vpop.permute.xlu1 %2399 }
 0x277   :  { %v2435_v46 = vmul.f32 %v3663_v35, %v2400_v10 }
 0x278   :  { %v2736_v15 = vadd.f32 %v2735_v16, %v2721_v24  ;;  %v2464_v16 = vld [vmem:[#allocation8 + $0x6] sm:$0x1] }
 0x279   :  { %v2450_v33 = vadd.f32 %v2449_v3, %v2435_v46 }
 0x27a   :  { %v2737_v13 = vadd.f32 %v2736_v15, %v2722_v27  ;;  %v2404_v54 = vpop.permute.xlu1 %2403 }
 0x27b   :  { %v2436_v19 = vmul.f32 %v3665_v1, %v2404_v54 }
 0x27c   :  { %v2738_v53 = vadd.f32 %v2737_v13, %v2723_v0 }
 0x27d   :  { %v2451_v29 = vadd.f32 %v2450_v33, %v2436_v19 }
 0x27e   :  { %v2739_v48 = vrot.slane %v2738_v53, 4  ;;  %v2408_v7 = vpop.permute.xlu1 %2407 }
 0x27f   :  { %v2437_v38 = vmul.f32 %v3667_v43, %v2408_v7 }
 0x280   :  { %v2740_v57 = vadd.f32 %v2739_v48, %v2738_v53 }
 0x281   :  { %v2452_v56 = vadd.f32 %v2451_v29, %v2437_v38 }
 0x282   :  { %v2741_v2 = vrot.slane %v2740_v57, 2  ;;  %v2412_v62 = vpop.permute.xlu1 %2411 }
 0x283   :  { %v2438_v44 = vmul.f32 %v3669_v36, %v2412_v62 }
 0x284   :  { %v2742_v22 = vadd.f32 %v2741_v2, %v2740_v57 }
 0x285   :  { %v2453_v17 = vadd.f32 %v2452_v56, %v2438_v44 }
 0x286   :  { %v2416_v42 = vpop.permute.xlu1 %2415  ;;  %v2743_v31 = vrot.slane %v2742_v22, 1 }
 0x287   :  { %v2439_v12 = vmul.f32 %v3671_v41, %v2416_v42 }
 0x288   :  { %v2744_v5 = vadd.f32 %v2743_v31, %v2742_v22 }
 0x289   :  { %v2454_v26 = vadd.f32 %v2453_v17, %v2439_v12 }
 0x28a   :  { %v2420_v63 = vpop.permute.xlu1 %2419  ;;  %v2747_v34 = vadd.f32 %v2746_v6, %v2744_v5 }
 0x28b   :  { %v2440_v21 = vmul.f32 %v3673_v8, %v2420_v63 }
 0x28c   :  { %2748 = vst [vmem:[#allocation10 + $0x7] sm:$0x1] %v2747_v34 }
 0x28d   :  { %v2455_v40 = vadd.f32 %v2454_v26, %v2440_v21 }
 0x28e   :  { %v2424_v39 = vpop.permute.xlu1 %2423 }
 0x28f   :  { %v2441_v50 = vmul.f32 %v3675_v45, %v2424_v39 }
 0x291   :  { %v2456_v30 = vadd.f32 %v2455_v40, %v2441_v50 }
 0x293   :  { %v2457_v47 = vrot.slane %v2456_v30, 4 }
 0x295   :  { %v2458_v60 = vadd.f32 %v2457_v47, %v2456_v30 }
 0x297   :  { %v2459_v28 = vrot.slane %v2458_v60, 2 }
 0x299   :  { %v2460_v25 = vadd.f32 %v2459_v28, %v2458_v60 }
 0x29b   :  { %v2461_v24 = vrot.slane %v2460_v25, 1 }
 0x29d   :  { %v2462_v10 = vadd.f32 %v2461_v24, %v2460_v25 }
 0x29f   :  { %v2465_v51 = vadd.f32 %v2464_v16, %v2462_v10 }
 0x2a1   :  { %2466 = vst [vmem:[#allocation10 + $0x6] sm:$0x1] %v2465_v51 }
 0x2a2   :  { %3767 = shalt.err (!%p3764_p10)
}
 0x2a3   :  { %2758 = dma.vmem_to_hbm [thread:$0]  %s2756_s3, 128, %s5003_s4, [#allocation4]  }
 0x2a4   :  { %3782 = dma.done.wait [#allocation4], 128  }
 0x2a5   :  { %3783 = vsyncadd [#allocation4], 4294967168 }
 0x2a6   :  { %2762 = vsyncpa [#allocation3], 1 }
 0x2a7   :  { %2763 = vsyncpa [#allocation6], 1 }
 0x2a8   :  { %2764 = vsyncpa [#allocation9], 1 }
 0x2a9   :  { %2765 = vsyncpa [#allocation4], 1 }

</bundles_post_ra>
